<compile_context>
chip_gen: v7x
topology: tpu7x:2x2x1
jax: 0.10.0
libtpu: 0.0.40
codegen_flags: <defaults>
</compile_context>

<pallas_src>
import functools

import jax
import jax.numpy as jnp
from jax.experimental import pallas as pl
from jax.experimental.pallas import tpu as pltpu


HIDDEN = 768
FC1 = 512
FC2 = 256
NUM_LABELS = 4

# Conservative, generation-portable budgets.
_ACT_STREAM_BUDGET = 24 << 20   # double-buffered activation stream target
_VMEM_LIMIT_CAP = 48 << 20      # stays safe on v7x's 64 MiB physical VMEM


def _classifier_kernel(h_ref, w1_ref, b1_ref, w2_ref, b2_ref, w3_ref, b3_ref,
                       o_ref, acc_ref, *, seq_len, t_chunk, needs_mask):
    """One grid step: accumulate sum over a sequence chunk; finalize MLP on last step."""
    k = pl.program_id(1)

    @pl.when(k == 0)
    def _init():
        acc_ref[...] = jnp.zeros_like(acc_ref)

    # (b_blk, tc, H) chunk in its native dtype -> f32 partial sum over sequence axis.
    h = h_ref[...].astype(jnp.float32)

    if needs_mask:
        # Ragged tail handled in-kernel: rows >= seq_len in this chunk are
        # out-of-bounds garbage from the edge DMA -> select them to zero.
        row = jax.lax.broadcasted_iota(jnp.int32, (1, t_chunk, 1), 1)
        h = jnp.where(row < (seq_len - k * t_chunk), h, 0.0)

    acc_ref[...] += jnp.sum(h, axis=1)

    @pl.when(k == pl.num_programs(1) - 1)
    def _finalize():
        # Mean over the true (unpadded) sequence length.
        pooled = acc_ref[...] * (1.0 / float(seq_len))            # (b_blk, H), f32

        # Linear(768, 512) + ReLU   (Dropout(0.2) -> identity in inference)
        x = jnp.dot(pooled.astype(w1_ref.dtype), w1_ref[...],
                    preferred_element_type=jnp.float32) + b1_ref[...]
        x = jnp.maximum(x, 0.0)

        # Linear(512, 256) + ReLU   (Dropout(0.2) -> identity in inference)
        x = jnp.dot(x.astype(w2_ref.dtype), w2_ref[...],
                    preferred_element_type=jnp.float32) + b2_ref[...]
        x = jnp.maximum(x, 0.0)

        # Linear(256, num_labels)
        logits = jnp.dot(x.astype(w3_ref.dtype), w3_ref[...],
                         preferred_element_type=jnp.float32) + b3_ref[...]
        o_ref[...] = logits.astype(o_ref.dtype)


def _round_up(x, m):
    return ((x + m - 1) // m) * m


def _round_down(x, m):
    return (x // m) * m


def custom_audio_classifier_head(hidden_states, params, *, t_chunk=None):
    """hidden_states: (B, T, 768) (f32 or bf16); params: dict of classifier weights.

    Streams sequence chunks straight from HBM (no extra cast/pad passes),
    accumulates the pooled sum in an f32 VMEM scratch, and runs the MLP once
    in the final grid step.
    """
    B, T, H = hidden_states.shape
    assert H == HIDDEN, f"expected hidden dim {HIDDEN}, got {H}"

    # Weights VMEM-resident in bf16 (MXU-native, half the footprint); biases f32.
    w1 = params["w1"].astype(jnp.bfloat16)
    w2 = params["w2"].astype(jnp.bfloat16)
    w3 = params["w3"].astype(jnp.bfloat16)
    b1 = params["b1"].astype(jnp.float32)
    b2 = params["b2"].astype(jnp.float32)
    b3 = params["b3"].astype(jnp.float32)
    num_labels = w3.shape[1]

    # No wrapper-side cast / pad of the big activation slab (that would add a
    # full extra HBM read+write pass each on an HBM-bound workload).
    hs = hidden_states
    itemsize = jnp.dtype(hs.dtype).itemsize
    align = 16 if itemsize == 2 else 8

    # Batch blocking: leading "parallel" grid axis (megacore on v7x when B allows).
    b_block = 8 if (B % 8 == 0 and B > 8) else B

    # VMEM-budget-aware sequence chunk size (largest aligned chunk under budget).
    row_bytes = b_block * HIDDEN * itemsize
    tc_cap = max(align, _round_down(_ACT_STREAM_BUDGET // (2 * row_bytes), align))
    if t_chunk is None:
        tc = min(tc_cap, _round_down(T, align)) if T >= align else align
    else:
        tc = min(max(align, _round_up(t_chunk, align)), tc_cap)
    num_chunks = pl.cdiv(T, tc)
    needs_mask = (num_chunks * tc) != T

    kernel = functools.partial(_classifier_kernel,
                               seq_len=T, t_chunk=tc, needs_mask=needs_mask)

    # Explicit, generation-aware VMEM budget (double-buffered activations +
    # double-buffered constants + accumulator + headroom).
    weight_bytes = sum(int(a.size) * jnp.dtype(a.dtype).itemsize
                       for a in (w1, b1, w2, b2, w3, b3))
    act_bytes = b_block * tc * HIDDEN * itemsize
    vmem_need = 2 * act_bytes + 2 * weight_bytes + b_block * HIDDEN * 4 + (2 << 20)
    vmem_limit = int(min(_VMEM_LIMIT_CAP, max(vmem_need, 16 << 20)))

    cost = pl.CostEstimate(
        flops=B * T * HIDDEN
        + 2 * B * (HIDDEN * FC1 + FC1 * FC2 + FC2 * num_labels),
        transcendentals=0,
        bytes_accessed=B * T * HIDDEN * itemsize + weight_bytes + B * num_labels * 4,
    )

    grid_spec = pltpu.PrefetchScalarGridSpec(
        num_scalar_prefetch=0,
        grid=(B // b_block, num_chunks),
        in_specs=[
            # Streamed activation chunks.
            pl.BlockSpec((b_block, tc, HIDDEN), lambda b, k: (b, k, 0)),
            # Weights/biases: constant index_map -> VMEM-resident across steps.
            pl.BlockSpec(w1.shape, lambda b, k: (0, 0)),
            pl.BlockSpec(b1.shape, lambda b, k: (0, 0)),
            pl.BlockSpec(w2.shape, lambda b, k: (0, 0)),
            pl.BlockSpec(b2.shape, lambda b, k: (0, 0)),
            pl.BlockSpec(w3.shape, lambda b, k: (0, 0)),
            pl.BlockSpec(b3.shape, lambda b, k: (0, 0)),
        ],
        out_specs=pl.BlockSpec((b_block, num_labels), lambda b, k: (b, 0)),
        scratch_shapes=[pltpu.VMEM((b_block, HIDDEN), jnp.float32)],
    )

    return pl.pallas_call(
        kernel,
        out_shape=jax.ShapeDtypeStruct((B, num_labels), jnp.float32),
        grid_spec=grid_spec,
        compiler_params=pltpu.CompilerParams(
            dimension_semantics=("parallel", "arbitrary"),
            vmem_limit_bytes=vmem_limit,
        ),
        cost_estimate=cost,
    )(hs, w1, b1, w2, b2, w3, b3)


def init_params(key):
    """Deterministic classifier parameters (PyTorch-style uniform init bounds)."""
    ks = jax.random.split(key, 6)

    def linear(kw, kb, fan_in, fan_out):
        bound = 1.0 / jnp.sqrt(jnp.float32(fan_in))
        w = jax.random.uniform(kw, (fan_in, fan_out), jnp.float32, -bound, bound)
        # biases kept 2D (1, fan_out) for clean TPU lane layout / broadcasting
        b = jax.random.uniform(kb, (1, fan_out), jnp.float32, -bound, bound)
        return w, b

    w1, b1 = linear(ks[0], ks[1], HIDDEN, FC1)
    w2, b2 = linear(ks[2], ks[3], FC1, FC2)
    w3, b3 = linear(ks[4], ks[5], FC2, NUM_LABELS)
    return {"w1": w1, "b1": b1, "w2": w2, "b2": b2, "w3": w3, "b3": b3}


def reference(hidden_states, params):
    """Full-precision (f32) reference mirroring the PyTorch module at inference."""
    pooled = jnp.mean(hidden_states.astype(jnp.float32), axis=1)
    x = jnp.maximum(pooled @ params["w1"] + params["b1"], 0.0)
    x = jnp.maximum(x @ params["w2"] + params["b2"], 0.0)
    return x @ params["w3"] + params["b3"]


def _check(name, got, want, atol=1e-2, rtol=1e-2):
    err = float(jnp.max(jnp.abs(got - want)))
    assert jnp.allclose(got, want, atol=atol, rtol=rtol), (
        f"{name}: mismatch, max abs err {err}"
    )


if __name__ == "__main__":
    key = jax.random.PRNGKey(0)
    k_h, k_h2, k_p = jax.random.split(key, 3)

    params = init_params(k_p)

    # Primary small case: B=2, T=8 -> single exact chunk, no masking.
    B, T = 2, 8
    hidden_states = jax.random.normal(k_h, (B, T, HIDDEN), jnp.float32)
    logits = jax.block_until_ready(custom_audio_classifier_head(hidden_states, params))
    assert logits.shape == (B, NUM_LABELS)
    _check("single-chunk", logits, reference(hidden_states, params))

    # Ragged case, explicit small chunk: T=50 with tc=16 -> 4 chunks, in-kernel
    # tail masking, multi-step accumulation across the reduction grid.
    B2, T2 = 2, 50
    hidden_states2 = jax.random.normal(k_h2, (B2, T2, HIDDEN), jnp.float32)
    logits2 = jax.block_until_ready(
        custom_audio_classifier_head(hidden_states2, params, t_chunk=16))
    assert logits2.shape == (B2, NUM_LABELS)
    _check("ragged-explicit-chunk", logits2, reference(hidden_states2, params))

    # Ragged case, auto (VMEM-budgeted) chunking on the same data.
    logits3 = jax.block_until_ready(
        custom_audio_classifier_head(hidden_states2, params))
    _check("ragged-auto-chunk", logits3, reference(hidden_states2, params))

    print("KERNEL_OK")
</pallas_src>

<mosaic_0001>
module attributes {stable_mosaic.version = 11 : i64} {
  func.func @_classifier_kernel(%arg0: i32, %arg1: i32, %arg2: memref<2x8x768xf32, #tpu.memory_space<vmem>>, %arg3: memref<768x512xbf16, #tpu.memory_space<vmem>>, %arg4: memref<1x512xf32, #tpu.memory_space<vmem>>, %arg5: memref<512x256xbf16, #tpu.memory_space<vmem>>, %arg6: memref<1x256xf32, #tpu.memory_space<vmem>>, %arg7: memref<256x4xbf16, #tpu.memory_space<vmem>>, %arg8: memref<1x4xf32, #tpu.memory_space<vmem>>, %arg9: memref<2x4xf32, #tpu.memory_space<vmem>>, %arg10: memref<2x768xf32, #tpu.memory_space<vmem>>) attributes {dimension_semantics = [#tpu.dimension_semantics<parallel>, #tpu.dimension_semantics<arbitrary>], iteration_bounds = array<i64: 1, 1>, scalar_prefetch = 0 : i64, scratch_operands = 1 : i64, tpu.core_type = #tpu.core_type<tc>, window_params = [{transform_indices = @transform_0, window_bounds = array<i64: 2, 8, 768>}, {pipeline_mode = #tpu.pipeline_mode<synchronous>, transform_indices = @transform_1, window_bounds = array<i64: 768, 512>}, {pipeline_mode = #tpu.pipeline_mode<synchronous>, transform_indices = @transform_2, window_bounds = array<i64: 1, 512>}, {pipeline_mode = #tpu.pipeline_mode<synchronous>, transform_indices = @transform_3, window_bounds = array<i64: 512, 256>}, {pipeline_mode = #tpu.pipeline_mode<synchronous>, transform_indices = @transform_4, window_bounds = array<i64: 1, 256>}, {pipeline_mode = #tpu.pipeline_mode<synchronous>, transform_indices = @transform_5, window_bounds = array<i64: 256, 4>}, {pipeline_mode = #tpu.pipeline_mode<synchronous>, transform_indices = @transform_6, window_bounds = array<i64: 1, 4>}, {transform_indices = @transform_7, window_bounds = array<i64: 2, 4>}]} {
    %c0_i32 = arith.constant 0 : i32
    %0 = arith.cmpi eq, %arg1, %c0_i32 : i32
    %1 = arith.extui %0 : i1 to i32
    %c0_i32_0 = arith.constant 0 : i32
    %2 = arith.cmpi ne, %1, %c0_i32_0 : i32
    scf.if %2 {
      %cst_9 = arith.constant 0.000000e+00 : f32
      %11 = vector.broadcast %cst_9 : f32 to vector<2x768xf32>
      %c0_10 = arith.constant 0 : index
      %c0_11 = arith.constant 0 : index
      %12 = vector.load %arg10[%c0_10, %c0_11] : memref<2x768xf32, #tpu.memory_space<vmem>>, vector<2x768xf32>
      tpu.vector_store %arg10[%c0_10, %c0_11], %11 {strides = array<i32>} : memref<2x768xf32, #tpu.memory_space<vmem>>, vector<2x768xf32>,
    } else {
    }
    %c0 = arith.constant 0 : index
    %c0_1 = arith.constant 0 : index
    %c0_2 = arith.constant 0 : index
    %3 = vector.load %arg2[%c0, %c0_1, %c0_2] : memref<2x8x768xf32, #tpu.memory_space<vmem>>, vector<2x8x768xf32>
    %c0_3 = arith.constant 0 : index
    %c0_4 = arith.constant 0 : index
    %4 = vector.load %arg10[%c0_3, %c0_4] : memref<2x768xf32, #tpu.memory_space<vmem>>, vector<2x768xf32>
    %cst = arith.constant dense<0.000000e+00> : vector<2x768xf32>
    %5 = vector.multi_reduction <add>, %3, %cst [1] : vector<2x8x768xf32> to vector<2x768xf32>
    %6 = arith.addf %4, %5 : vector<2x768xf32>
    %c0_5 = arith.constant 0 : index
    %c0_6 = arith.constant 0 : index
    %7 = vector.load %arg10[%c0_5, %c0_6] : memref<2x768xf32, #tpu.memory_space<vmem>>, vector<2x768xf32>
    tpu.vector_store %arg10[%c0_5, %c0_6], %6 {strides = array<i32>} : memref<2x768xf32, #tpu.memory_space<vmem>>, vector<2x768xf32>,
    %c0_i32_7 = arith.constant 0 : i32
    %8 = arith.cmpi eq, %arg1, %c0_i32_7 : i32
    %9 = arith.extui %8 : i1 to i32
    %c0_i32_8 = arith.constant 0 : i32
    %10 = arith.cmpi ne, %9, %c0_i32_8 : i32
    scf.if %10 {
      %c0_9 = arith.constant 0 : index
      %c0_10 = arith.constant 0 : index
      %11 = vector.load %arg10[%c0_9, %c0_10] : memref<2x768xf32, #tpu.memory_space<vmem>>, vector<2x768xf32>
      %cst_11 = arith.constant 1.250000e-01 : f32
      %12 = vector.broadcast %cst_11 : f32 to vector<2x768xf32>
      %13 = arith.mulf %11, %12 : vector<2x768xf32>
      %14 = arith.truncf %13 : vector<2x768xf32> to vector<2x768xbf16>
      %c0_12 = arith.constant 0 : index
      %c0_13 = arith.constant 0 : index
      %15 = vector.load %arg3[%c0_12, %c0_13] : memref<768x512xbf16, #tpu.memory_space<vmem>>, vector<768x512xbf16>
      %cst_14 = arith.constant dense<0.000000e+00> : vector<2x512xf32>
      %16 = tpu.matmul %14, %15, %cst_14 {dimension_numbers = #tpu.dot_dimension_numbers<[1], [0], [0], [1], [0, 0, 1, 1], [], []>} : vector<2x768xbf16>, vector<768x512xbf16>, vector<2x512xf32> -> vector<2x512xf32>
      %c0_15 = arith.constant 0 : index
      %c0_16 = arith.constant 0 : index
      %17 = vector.load %arg4[%c0_15, %c0_16] : memref<1x512xf32, #tpu.memory_space<vmem>>, vector<1x512xf32>
      %18 = vector.broadcast %17 : vector<1x512xf32> to vector<2x512xf32>
      %19 = arith.addf %16, %18 : vector<2x512xf32>
      %cst_17 = arith.constant 0.000000e+00 : f32
      %20 = vector.broadcast %cst_17 : f32 to vector<2x512xf32>
      %21 = arith.maximumf %19, %20 : vector<2x512xf32>
      %22 = arith.truncf %21 : vector<2x512xf32> to vector<2x512xbf16>
      %c0_18 = arith.constant 0 : index
      %c0_19 = arith.constant 0 : index
      %23 = vector.load %arg5[%c0_18, %c0_19] : memref<512x256xbf16, #tpu.memory_space<vmem>>, vector<512x256xbf16>
      %cst_20 = arith.constant dense<0.000000e+00> : vector<2x256xf32>
      %24 = tpu.matmul %22, %23, %cst_20 {dimension_numbers = #tpu.dot_dimension_numbers<[1], [0], [0], [1], [0, 0, 1, 1], [], []>} : vector<2x512xbf16>, vector<512x256xbf16>, vector<2x256xf32> -> vector<2x256xf32>
      %c0_21 = arith.constant 0 : index
      %c0_22 = arith.constant 0 : index
      %25 = vector.load %arg6[%c0_21, %c0_22] : memref<1x256xf32, #tpu.memory_space<vmem>>, vector<1x256xf32>
      %26 = vector.broadcast %25 : vector<1x256xf32> to vector<2x256xf32>
      %27 = arith.addf %24, %26 : vector<2x256xf32>
      %cst_23 = arith.constant 0.000000e+00 : f32
      %28 = vector.broadcast %cst_23 : f32 to vector<2x256xf32>
      %29 = arith.maximumf %27, %28 : vector<2x256xf32>
      %30 = arith.truncf %29 : vector<2x256xf32> to vector<2x256xbf16>
      %c0_24 = arith.constant 0 : index
      %c0_25 = arith.constant 0 : index
      %31 = vector.load %arg7[%c0_24, %c0_25] : memref<256x4xbf16, #tpu.memory_space<vmem>>, vector<256x4xbf16>
      %cst_26 = arith.constant dense<0.000000e+00> : vector<2x4xf32>
      %32 = tpu.matmul %30, %31, %cst_26 {dimension_numbers = #tpu.dot_dimension_numbers<[1], [0], [0], [1], [0, 0, 1, 1], [], []>} : vector<2x256xbf16>, vector<256x4xbf16>, vector<2x4xf32> -> vector<2x4xf32>
      %c0_27 = arith.constant 0 : index
      %c0_28 = arith.constant 0 : index
      %33 = vector.load %arg8[%c0_27, %c0_28] : memref<1x4xf32, #tpu.memory_space<vmem>>, vector<1x4xf32>
      %34 = vector.broadcast %33 : vector<1x4xf32> to vector<2x4xf32>
      %35 = arith.addf %32, %34 : vector<2x4xf32>
      %c0_29 = arith.constant 0 : index
      %c0_30 = arith.constant 0 : index
      %36 = vector.load %arg9[%c0_29, %c0_30] : memref<2x4xf32, #tpu.memory_space<vmem>>, vector<2x4xf32>
      tpu.vector_store %arg9[%c0_29, %c0_30], %35 {strides = array<i32>} : memref<2x4xf32, #tpu.memory_space<vmem>>, vector<2x4xf32>,
    } else {
    }
    return
  }
  func.func @transform_0(%arg0: i32, %arg1: i32) -> (i32, i32, i32) {
    %c0_i32 = arith.constant 0 : i32
    %c0_i32_0 = arith.constant 0 : i32
    return %arg0, %arg1, %c0_i32 : i32, i32, i32
  }
  func.func @transform_1(%arg0: i32, %arg1: i32) -> (i32, i32) {
    %c0_i32 = arith.constant 0 : i32
    %c0_i32_0 = arith.constant 0 : i32
    %c0_i32_1 = arith.constant 0 : i32
    return %c0_i32, %c0_i32_0 : i32, i32
  }
  func.func @transform_2(%arg0: i32, %arg1: i32) -> (i32, i32) {
    %c0_i32 = arith.constant 0 : i32
    %c0_i32_0 = arith.constant 0 : i32
    %c0_i32_1 = arith.constant 0 : i32
    return %c0_i32, %c0_i32_0 : i32, i32
  }
  func.func @transform_3(%arg0: i32, %arg1: i32) -> (i32, i32) {
    %c0_i32 = arith.constant 0 : i32
    %c0_i32_0 = arith.constant 0 : i32
    %c0_i32_1 = arith.constant 0 : i32
    return %c0_i32, %c0_i32_0 : i32, i32
  }
  func.func @transform_4(%arg0: i32, %arg1: i32) -> (i32, i32) {
    %c0_i32 = arith.constant 0 : i32
    %c0_i32_0 = arith.constant 0 : i32
    %c0_i32_1 = arith.constant 0 : i32
    return %c0_i32, %c0_i32_0 : i32, i32
  }
  func.func @transform_5(%arg0: i32, %arg1: i32) -> (i32, i32) {
    %c0_i32 = arith.constant 0 : i32
    %c0_i32_0 = arith.constant 0 : i32
    %c0_i32_1 = arith.constant 0 : i32
    return %c0_i32, %c0_i32_0 : i32, i32
  }
  func.func @transform_6(%arg0: i32, %arg1: i32) -> (i32, i32) {
    %c0_i32 = arith.constant 0 : i32
    %c0_i32_0 = arith.constant 0 : i32
    %c0_i32_1 = arith.constant 0 : i32
    return %c0_i32, %c0_i32_0 : i32, i32
  }
  func.func @transform_7(%arg0: i32, %arg1: i32) -> (i32, i32) {
    %c0_i32 = arith.constant 0 : i32
    %c0_i32_0 = arith.constant 0 : i32
    return %arg0, %c0_i32 : i32, i32
  }
}

</mosaic_0001>

<bundles_post_ra>
// kernel: tpu_custom_call.1
= control target key start
LH: loop header
LB: loop body
LE: loop exit
PB: predicated region body
PF: predicated region fallthrough
CT: control target
= control target key end

     0   :  { %12 = vsyncpa [#allocation4], 0  ;;  %s3428_s0 = inlined_call_operand.vmem [shape: f32[2,8,768], index: 0, kind: input, shape index: {}]   ;;  %s3429_s1 = inlined_call_operand.hbm [shape: bf16[768,512], index: 1, kind: input, shape index: {}]   ;;  %s3430_s2 = inlined_call_operand.vmem [shape: f32[1,512], index: 2, kind: input, shape index: {}]   ;;  %s3431_s3 = inlined_call_operand.hbm [shape: bf16[512,256], index: 3, kind: input, shape index: {}]   ;;  %s3432_s4 = inlined_call_operand.vmem [shape: f32[1,256], index: 4, kind: input, shape index: {}]   ;;  %s3433_s5 = inlined_call_operand.vmem [shape: bf16[256,4], index: 5, kind: input, shape index: {}]   ;;  %s3434_s6 = inlined_call_operand.vmem [shape: f32[1,4], index: 6, kind: input, shape index: {}]   ;;  %s3435_s7 = inlined_call_operand.hbm [shape: f32[2,4], index: 7, kind: output, shape index: {}]  }
   0x1   :  { %13 = vsyncpa [#allocation7], 0 }
   0x2   :  { %14 = vsyncpa [#allocation5], 0  ;;  %s3185_s24 = smov [#allocation3]   ;;  %s3113_s28 = scalar_lea.hbm %s3429_s1, 24576 }
   0x3   :  { %s22_s25 = sshll.u32 %s3185_s24, 4  ;;  %p3114_p0 = scmp.ne.s32.totalorder %s3429_s1, %s3113_s28  ;;  %s23_s25 = int_to_ptr.vmem [resolvable:$true] %s22_s25 }
   0x4   :  { %p3117_p1 = scmp.lt.u32.totalorder %s3113_s28, %s3429_s1 }
   0x6   :  { %p3119_p2 = pnand %p3117_p1, %p3114_p0 }
   0x8   :  { %3122 = shalt.err (!%p3119_p2)
}
   0x9   :  { %s3123_s10 = scalar_lea.vmem %s23_s25, 24576  ;;  %p3128_p4 = scmp.lt.s32.totalorder %s23_s25, %s23_s25 }
   0xa   :  { %p3124_p3 = scmp.ne.s32.totalorder %s23_s25, %s3123_s10  ;;  %p3129_p5 = scmp.lt.s32.totalorder %s3123_s10, %s3123_s10 }
   0xc   :  { %p3130_p6 = por %p3129_p5, %p3128_p4 }
   0xe   :  { %p3131_p7 = pnand %p3130_p6, %p3124_p3 }
  0x10   :  { %3134 = shalt.err (!%p3131_p7)
}
  0x11   :  { %s3186_s11 = smov 256   ;;  %s3187_s12 = smov 16  }
  0x12   :  { %28 = dma.hbm_to_vmem [thread:$0]  %s3429_s1, 24576, %s23_s25, [#allocation4], %s3186_s11, %s3186_s11, %s3187_s12  }
  0x13   :  { %s3188_s15 = smov [#allocation6]   ;;  %s3135_s19 = scalar_lea.hbm %s3431_s3, 8192 }
  0x14   :  { %s36_s16 = sshll.u32 %s3188_s15, 4  ;;  %p3136_p8 = scmp.ne.s32.totalorder %s3431_s3, %s3135_s19  ;;  %s37_s16 = int_to_ptr.vmem [resolvable:$true] %s36_s16 }
  0x15   :  { %p3139_p9 = scmp.lt.u32.totalorder %s3135_s19, %s3431_s3 }
  0x17   :  { %p3141_p10 = pnand %p3139_p9, %p3136_p8 }
  0x19   :  { %3144 = shalt.err (!%p3141_p10)
}
  0x1a   :  { %s3145_s24 = scalar_lea.vmem %s37_s16, 8192  ;;  %p3150_p12 = scmp.lt.s32.totalorder %s37_s16, %s37_s16 }
  0x1b   :  { %p3146_p11 = scmp.ne.s32.totalorder %s37_s16, %s3145_s24  ;;  %p3151_p13 = scmp.lt.s32.totalorder %s3145_s24, %s3145_s24 }
  0x1d   :  { %p3152_p0 = por %p3151_p13, %p3150_p12 }
  0x1f   :  { %p3153_p1 = pnand %p3152_p0, %p3146_p11 }
  0x21   :  { %3156 = shalt.err (!%p3153_p1)
}
  0x22   :  { %s3189_s1 = smov 128   ;;  %s3190_s25 = smov 8  }
  0x23   :  { %42 = dma.hbm_to_vmem [thread:$0]  %s3431_s3, 8192, %s37_s16, [#allocation7], %s3189_s1, %s3189_s1, %s3190_s25  }
  0x24   :  { %3179 = dma.done.wait [#allocation4], 24576  }
  0x25   :  { %3180 = vsyncadd [#allocation4], 4294942720 }
  0x26   :  { %3181 = dma.done.wait [#allocation7], 8192  }
  0x27   :  { %3182 = vsyncadd [#allocation7], 4294959104  ;;  %v3191_v0 = vmov 0.0   ;;  %v2713_v1 = vld [vmem:[#allocation3 + $0x4] ss:$16 sps:$4 sm:$0xff]   ;;  %v165_v45 = vlaneseq  ;;  %v63_v55 = vld [vmem:[%s3428_s0 + $0x8] sm:$0xff] }
  0x28   :  { %61 = vst [vmem:[#allocation2 + $0x8] sm:$0xf] %v3191_v0  ;;  %v2715_v2 = vld [vmem:[#allocation3 + $0x204] ss:$16 sps:$4 sm:$0xff]   ;;  %1456 = vmatprep.subr.bf16.mxu1 %v2713_v1  ;;  %v2717_v3 = vld [vmem:[#allocation3] ss:$16 sps:$4 sm:$0xff]  }
  0x29   :  { %v2718_v4 = vld [vmem:[#allocation3 + $0x200] ss:$16 sps:$4 sm:$0xff]   ;;  %1497 = vmatprep.subr.bf16.mxu0 %v2715_v2  ;;  %v2719_v5 = vld [vmem:[#allocation3 + $0x24] ss:$16 sps:$4 sm:$0xff]   ;;  %1457 = vmatpush1.bf16.msra.mxu1 %v2717_v3  ;;  %v3192_v47 = vmov 1983009808  }
  0x2a   :  { %1498 = vmatpush1.bf16.msra.mxu0 %v2718_v4  ;;  %v2721_v6 = vld [vmem:[#allocation3 + $0x224] ss:$16 sps:$4 sm:$0xff]   ;;  %v2723_v7 = vld [vmem:[#allocation3 + $0x20] ss:$16 sps:$4 sm:$0xff]   ;;  %1458 = vmatprep.subr.bf16.mxu1 %v2719_v5  ;;  %v3258_v48 = vunpack.c.l.s4 %v3192_v47  ;;  %v3272_v59 = vshrl.u32 %v165_v45, 7  ;;  %v82_v63 = vrot.slane %v63_v55, 4 }
  0x2b   :  { %v2724_v8 = vld [vmem:[#allocation3 + $0x220] ss:$16 sps:$4 sm:$0xff]   ;;  %1499 = vmatprep.subr.bf16.mxu0 %v2721_v6  ;;  %v2725_v9 = vld [vmem:[#allocation3 + $0x44] ss:$16 sps:$4 sm:$0xff]   ;;  %vm215_vm0 = vcmask 1041409   ;;  %vm217_vm1 = vcmask 1043459  }
  0x2c   :  { %v2727_v10 = vld [vmem:[#allocation3 + $0x244] ss:$16 sps:$4 sm:$0xff]   ;;  %v2729_v11 = vld [vmem:[#allocation3 + $0x40] ss:$16 sps:$4 sm:$0xff]   ;;  %v164_v2 = vunpack.c.0.s8 %v3258_v48  ;;  %vm219_vm2 = vcmask 1045509   ;;  %vm221_vm3 = vcmask 1047559  }
  0x2d   :  { %v2730_v12 = vld [vmem:[#allocation3 + $0x240] ss:$16 sps:$4 sm:$0xff]   ;;  %1459 = vmatpush1.bf16.msra.mxu1 %v2723_v7  ;;  %v2731_v13 = vld [vmem:[#allocation3 + $0x64] ss:$16 sps:$4 sm:$0xff]   ;;  %s3193_s10 = smov [#allocation8]   ;;  %vm2367_vm4 = vcmask 25600  }
  0x2e   :  { %1500 = vmatpush1.bf16.msra.mxu0 %v2724_v8  ;;  %1460 = vmatprep.subr.bf16.mxu1 %v2725_v9  ;;  %v2733_v14 = vld [vmem:[#allocation3 + $0x264] ss:$16 sps:$4 sm:$0xff]   ;;  %v2735_v15 = vld [vmem:[#allocation3 + $0x60] ss:$16 sps:$4 sm:$0xff]   ;;  %v83_v9 = vadd.f32 %v82_v63, %v63_v55  ;;  %s2375_s11 = sshll.u32 %s3193_s10, 4  ;;  %s2376_s11 = int_to_ptr.vmem [resolvable:$true] %s2375_s11 }
  0x2f   :  { %1501 = vmatprep.subr.bf16.mxu0 %v2727_v10  ;;  %v2736_v16 = vld [vmem:[#allocation3 + $0x260] ss:$16 sps:$4 sm:$0xff]   ;;  %v2737_v17 = vld [vmem:[#allocation3 + $0x84] ss:$16 sps:$4 sm:$0xff]   ;;  %s3157_s12 = scalar_lea.vmem %s2376_s11, 32  ;;  %p3162_p3 = scmp.lt.s32.totalorder %s2376_s11, %s2376_s11 }
  0x30   :  { %v2739_v18 = vld [vmem:[#allocation3 + $0x284] ss:$16 sps:$4 sm:$0xff]   ;;  %v2741_v19 = vld [vmem:[#allocation3 + $0x80] ss:$16 sps:$4 sm:$0xff]   ;;  %p3158_p2 = scmp.ne.s32.totalorder %s2376_s11, %s3157_s12  ;;  %p3163_p4 = scmp.lt.s32.totalorder %s3157_s12, %s3157_s12 }
  0x31   :  { %1461 = vmatpush1.bf16.msra.mxu1 %v2729_v11  ;;  %v2742_v20 = vld [vmem:[#allocation3 + $0x280] ss:$16 sps:$4 sm:$0xff]   ;;  %v2743_v21 = vld [vmem:[#allocation3 + $0xa4] ss:$16 sps:$4 sm:$0xff]  }
  0x32   :  { %1502 = vmatpush1.bf16.msra.mxu0 %v2730_v12  ;;  %1462 = vmatprep.subr.bf16.mxu1 %v2731_v13  ;;  %v2745_v22 = vld [vmem:[#allocation3 + $0x2a4] ss:$16 sps:$4 sm:$0xff]   ;;  %v2747_v23 = vld [vmem:[#allocation3 + $0xa0] ss:$16 sps:$4 sm:$0xff]   ;;  %p3164_p5 = por %p3163_p4, %p3162_p3 }
  0x33   :  { %1503 = vmatprep.subr.bf16.mxu0 %v2733_v14  ;;  %v2748_v24 = vld [vmem:[#allocation3 + $0x2a0] ss:$16 sps:$4 sm:$0xff]   ;;  %v2749_v25 = vld [vmem:[#allocation3 + $0xc4] ss:$16 sps:$4 sm:$0xff]  }
  0x34   :  { %v2751_v26 = vld [vmem:[#allocation3 + $0x2c4] ss:$16 sps:$4 sm:$0xff]   ;;  %v2753_v27 = vld [vmem:[#allocation3 + $0xc0] ss:$16 sps:$4 sm:$0xff]   ;;  %p3165_p6 = pnand %p3164_p5, %p3158_p2 }
  0x35   :  { %1463 = vmatpush1.bf16.msra.mxu1 %v2735_v15  ;;  %v2754_v28 = vld [vmem:[#allocation3 + $0x2c0] ss:$16 sps:$4 sm:$0xff]   ;;  %v2755_v29 = vld [vmem:[#allocation3 + $0xe4] ss:$16 sps:$4 sm:$0xff]  }
  0x36   :  { %1504 = vmatpush1.bf16.msra.mxu0 %v2736_v16  ;;  %1464 = vmatprep.subr.bf16.mxu1 %v2737_v17  ;;  %v2757_v30 = vld [vmem:[#allocation3 + $0x2e4] ss:$16 sps:$4 sm:$0xff]   ;;  %v2759_v31 = vld [vmem:[#allocation3 + $0xe0] ss:$16 sps:$4 sm:$0xff]  }
  0x37   :  { %1505 = vmatprep.subr.bf16.mxu0 %v2739_v18  ;;  %v2760_v32 = vld [vmem:[#allocation3 + $0x2e0] ss:$16 sps:$4 sm:$0xff]   ;;  %v2761_v33 = vld [vmem:[#allocation3 + $0x104] ss:$16 sps:$4 sm:$0xff]  }
  0x38   :  { %v2763_v34 = vld [vmem:[#allocation3 + $0x304] ss:$16 sps:$4 sm:$0xff]   ;;  %v2765_v35 = vld [vmem:[#allocation3 + $0x100] ss:$16 sps:$4 sm:$0xff]  }
  0x39   :  { %1465 = vmatpush1.bf16.msra.mxu1 %v2741_v19  ;;  %v2766_v36 = vld [vmem:[#allocation3 + $0x300] ss:$16 sps:$4 sm:$0xff]   ;;  %v2767_v37 = vld [vmem:[#allocation3 + $0x124] ss:$16 sps:$4 sm:$0xff]   ;;  %v84_v19 = vrot.slane %v83_v9, 2 }
  0x3a   :  { %1506 = vmatpush1.bf16.msra.mxu0 %v2742_v20  ;;  %1466 = vmatprep.subr.bf16.mxu1 %v2743_v21  ;;  %v2769_v38 = vld [vmem:[#allocation3 + $0x324] ss:$16 sps:$4 sm:$0xff]   ;;  %v2771_v39 = vld [vmem:[#allocation3 + $0x120] ss:$16 sps:$4 sm:$0xff]  }
  0x3b   :  { %1507 = vmatprep.subr.bf16.mxu0 %v2745_v22  ;;  %v2772_v40 = vld [vmem:[#allocation3 + $0x320] ss:$16 sps:$4 sm:$0xff]   ;;  %v2773_v41 = vld [vmem:[#allocation3 + $0x144] ss:$16 sps:$4 sm:$0xff]  }
  0x3c   :  { %v2775_v42 = vld [vmem:[#allocation3 + $0x344] ss:$16 sps:$4 sm:$0xff]   ;;  %v2777_v43 = vld [vmem:[#allocation3 + $0x140] ss:$16 sps:$4 sm:$0xff]  }
  0x3d   :  { %1467 = vmatpush1.bf16.msra.mxu1 %v2747_v23  ;;  %v2778_v44 = vld [vmem:[#allocation3 + $0x340] ss:$16 sps:$4 sm:$0xff]   ;;  %v2779_v46 = vld [vmem:[#allocation3 + $0x164] ss:$16 sps:$4 sm:$0xff]  }
  0x3e   :  { %1508 = vmatpush1.bf16.msra.mxu0 %v2748_v24  ;;  %1468 = vmatprep.subr.bf16.mxu1 %v2749_v25  ;;  %v2781_v49 = vld [vmem:[#allocation3 + $0x364] ss:$16 sps:$4 sm:$0xff]   ;;  %v2783_v50 = vld [vmem:[#allocation3 + $0x160] ss:$16 sps:$4 sm:$0xff]  }
  0x3f   :  { %1509 = vmatprep.subr.bf16.mxu0 %v2751_v26  ;;  %v2784_v51 = vld [vmem:[#allocation3 + $0x360] ss:$16 sps:$4 sm:$0xff]   ;;  %v62_v52 = vld [vmem:[%s3428_s0] sm:$0xff]  ;;  %v64_v56 = vld [vmem:[%s3428_s0 + $0x10] sm:$0xff] }
  0x40   :  { %v2785_v53 = vld [vmem:[#allocation3 + $0x184] ss:$16 sps:$4 sm:$0xff]   ;;  %v65_v57 = vld [vmem:[%s3428_s0 + $0x18] sm:$0xff]  ;;  %v76_v58 = vrot.slane %v62_v52, 4  ;;  %v88_v0 = vrot.slane %v64_v56, 4  ;;  %v71_v3 = vld [vmem:[%s3428_s0 + $0x48] sm:$0xff] }
  0x41   :  { %1469 = vmatpush1.bf16.msra.mxu1 %v2753_v27  ;;  %v2787_v54 = vld [vmem:[#allocation3 + $0x384] ss:$16 sps:$4 sm:$0xff]   ;;  %v69_v61 = vld [vmem:[%s3428_s0 + $0x38] sm:$0xff]  ;;  %v94_v1 = vrot.slane %v65_v57, 4  ;;  %v130_v12 = vrot.slane %v71_v3, 4 }
  0x42   :  { %1510 = vmatpush1.bf16.msra.mxu0 %v2754_v28  ;;  %1470 = vmatprep.subr.bf16.mxu1 %v2755_v29  ;;  %v68_v60 = vld [vmem:[%s3428_s0 + $0x30] sm:$0xff]  ;;  %v70_v62 = vld [vmem:[%s3428_s0 + $0x40] sm:$0xff]  ;;  %v77_v4 = vadd.f32 %v76_v58, %v62_v52  ;;  %v118_v6 = vrot.slane %v69_v61, 4  ;;  %v2789_v8 = vld [vmem:[#allocation3 + $0x180] ss:$16 sps:$4 sm:$0xff]   ;;  %v89_v10 = vadd.f32 %v88_v0, %v64_v56  ;;  %v85_v28 = vadd.f32 %v84_v19, %v83_v9 }
  0x43   :  { %1511 = vmatprep.subr.bf16.mxu0 %v2757_v30  ;;  %v112_v5 = vrot.slane %v68_v60, 4  ;;  %v124_v7 = vrot.slane %v70_v62, 4  ;;  %v95_v11 = vadd.f32 %v94_v1, %v65_v57  ;;  %v2790_v13 = vld [vmem:[#allocation3 + $0x380] ss:$16 sps:$4 sm:$0xff]   ;;  %v2791_v14 = vld [vmem:[#allocation3 + $0x1a4] ss:$16 sps:$4 sm:$0xff]   ;;  %v131_v22 = vadd.f32 %v130_v12, %v71_v3 }
  0x44   :  { %v78_v15 = vrot.slane %v77_v4, 2  ;;  %v119_v17 = vadd.f32 %v118_v6, %v69_v61  ;;  %v90_v20 = vrot.slane %v89_v10, 2  ;;  %v2793_v23 = vld [vmem:[#allocation3 + $0x3a4] ss:$16 sps:$4 sm:$0xff]   ;;  %v3290_v57 = vsub.s32 %v164_v2, %v3272_v59  ;;  %v2802_v58 = vld [vmem:[#allocation3 + $0x3c0] ss:$16 sps:$4 sm:$0xff]  }
  0x45   :  { %1471 = vmatpush1.bf16.msra.mxu1 %v2759_v31  ;;  %v113_v16 = vadd.f32 %v112_v5, %v68_v60  ;;  %v125_v18 = vadd.f32 %v124_v7, %v70_v62  ;;  %v96_v21 = vrot.slane %v95_v11, 2  ;;  %v132_v31 = vrot.slane %v131_v22, 2  ;;  %v2803_v60 = vld [vmem:[#allocation3 + $0x1e4] ss:$16 sps:$4 sm:$0xff]   ;;  %v2807_v6 = vld [vmem:[#allocation3 + $0x1e0] ss:$16 sps:$4 sm:$0xff]  }
  0x46   :  { %1512 = vmatpush1.bf16.msra.mxu0 %v2760_v32  ;;  %1472 = vmatprep.subr.bf16.mxu1 %v2761_v33  ;;  %v79_v24 = vadd.f32 %v78_v15, %v77_v4  ;;  %v120_v26 = vrot.slane %v119_v17, 2  ;;  %v91_v29 = vadd.f32 %v90_v20, %v89_v10  ;;  %v2795_v32 = vld [vmem:[#allocation3 + $0x1a0] ss:$16 sps:$4 sm:$0xff]   ;;  %v2805_v0 = vld [vmem:[#allocation3 + $0x3e4] ss:$16 sps:$4 sm:$0xff]  }
  0x47   :  { %1513 = vmatprep.subr.bf16.mxu0 %v2763_v34  ;;  %v114_v25 = vrot.slane %v113_v16, 2  ;;  %v126_v27 = vrot.slane %v125_v18, 2  ;;  %v97_v30 = vadd.f32 %v96_v21, %v95_v11  ;;  %v2796_v33 = vld [vmem:[#allocation3 + $0x3a0] ss:$16 sps:$4 sm:$0xff]   ;;  %v2814_v9 = vld [vmem:[#allocation3 + $0xc] ss:$16 sps:$4 sm:$0xff]  }
  0x48   :  { %v80_v34 = vrot.slane %v79_v24, 1  ;;  %v2808_v2 = vld [vmem:[#allocation3 + $0x3e0] ss:$16 sps:$4 sm:$0xff]  }
  0x49   :  { %1473 = vmatpush1.bf16.msra.mxu1 %v2765_v35  ;;  %v115_v35 = vadd.f32 %v114_v25, %v113_v16  ;;  %v2812_v25 = vld [vmem:[#allocation3 + $0x8] ss:$16 sps:$4 sm:$0xff]  }
  0x4a   :  { %1514 = vmatpush1.bf16.msra.mxu0 %v2766_v36  ;;  %1474 = vmatprep.subr.bf16.mxu1 %v2767_v37  ;;  %v121_v36 = vadd.f32 %v120_v26, %v119_v17  ;;  %v127_v37 = vadd.f32 %v126_v27, %v125_v18  ;;  %v2820_v27 = vld [vmem:[#allocation3 + $0x2c] ss:$16 sps:$4 sm:$0xff]  }
  0x4b   :  { %1515 = vmatprep.subr.bf16.mxu0 %v2769_v38  ;;  %v2797_v38 = vld [vmem:[#allocation3 + $0x1c4] ss:$16 sps:$4 sm:$0xff]   ;;  %v116_v45 = vrot.slane %v115_v35, 1 }
  0x4c   :  { %v128_v47 = vrot.slane %v127_v37, 1 }
  0x4d   :  { %1475 = vmatpush1.bf16.msra.mxu1 %v2771_v39  ;;  %v86_v39 = vrot.slane %v85_v28, 1 }
  0x4e   :  { %1516 = vmatpush1.bf16.msra.mxu0 %v2772_v40  ;;  %1476 = vmatprep.subr.bf16.mxu1 %v2773_v41  ;;  %v92_v40 = vrot.slane %v91_v29, 1  ;;  %v98_v41 = vrot.slane %v97_v30, 1  ;;  %v129_v56 = vadd.f32 %v128_v47, %v127_v37  ;;  %v2821_v37 = vld [vmem:[#allocation3 + $0x440] ss:$16 sps:$4 sm:$0xff]   ;;  %v2838_v47 = vld [vmem:[#allocation3 + $0x8c] ss:$16 sps:$4 sm:$0xff]  }
  0x4f   :  { %1517 = vmatprep.subr.bf16.mxu0 %v2775_v42  ;;  %v133_v42 = vadd.f32 %v132_v31, %v131_v22  ;;  %v2818_v31 = vld [vmem:[#allocation3 + $0x28] ss:$16 sps:$4 sm:$0xff]  }
  0x51   :  { %1477 = vmatpush1.bf16.msra.mxu1 %v2777_v43  ;;  %v2799_v43 = vld [vmem:[#allocation3 + $0x3c4] ss:$16 sps:$4 sm:$0xff]   ;;  %v134_v52 = vrot.slane %v133_v42, 1 }
  0x52   :  { %1518 = vmatpush1.bf16.msra.mxu0 %v2778_v44  ;;  %1478 = vmatprep.subr.bf16.mxu1 %v2779_v46  ;;  %v81_v44 = vadd.f32 %v80_v34, %v79_v24  ;;  %v122_v46 = vrot.slane %v121_v36, 1  ;;  %v2823_v34 = vld [vmem:[#allocation3 + $0x444] ss:$16 sps:$4 sm:$0xff]  }
  0x53   :  { %1519 = vmatprep.subr.bf16.mxu0 %v2781_v49  ;;  %v87_v49 = vadd.f32 %v86_v39, %v85_v28  ;;  %v135_v61 = vadd.f32 %v134_v52, %v133_v42  ;;  %v66_v39 = vld [vmem:[%s3428_s0 + $0x20] sm:$0xff] }
  0x54   :  { %v123_v55 = vadd.f32 %v122_v46, %v121_v36  ;;  %v2832_v36 = vld [vmem:[#allocation3 + $0x6c] ss:$16 sps:$4 sm:$0xff]   ;;  %v2830_v42 = vld [vmem:[#allocation3 + $0x68] ss:$16 sps:$4 sm:$0xff]  }
  0x55   :  { %1479 = vmatpush1.bf16.msra.mxu1 %v2783_v50  ;;  %v93_v50 = vadd.f32 %v92_v40, %v91_v29  ;;  %v160_v62 = vcombine.low %v81_v44, %v87_v49  ;;  %v186_v5 = vcombine.low %v129_v56, %v135_v61  ;;  %v2809_v29 = vld [vmem:[#allocation3 + $0x400] ss:$16 sps:$4 sm:$0xff]   ;;  %v100_v44 = vrot.slane %v66_v39, 4  ;;  %v2836_v56 = vld [vmem:[#allocation3 + $0x88] ss:$16 sps:$4 sm:$0xff]  }
  0x56   :  { %1520 = vmatpush1.bf16.msra.mxu0 %v2784_v51  ;;  %1480 = vmatprep.subr.bf16.mxu1 %v2785_v53  ;;  %v99_v51 = vadd.f32 %v98_v41, %v97_v30  ;;  %v2801_v53 = vld [vmem:[#allocation3 + $0x1c0] ss:$16 sps:$4 sm:$0xff]   ;;  %v2817_v30 = vld [vmem:[#allocation3 + $0x424] ss:$16 sps:$4 sm:$0xff]  }
  0x57   :  { %1521 = vmatprep.subr.bf16.mxu0 %v2787_v54  ;;  %v117_v54 = vadd.f32 %v116_v45, %v115_v35  ;;  %v168_v3 = vrot.slane %v160_v62, %v3290_v57  ;;  %v200_v7 = vrot.slane %v186_v5, %v3290_v57  ;;  %v2824_v35 = vld [vmem:[#allocation3 + $0x48] ss:$16 sps:$4 sm:$0xff]   ;;  %v67_v40 = vld [vmem:[%s3428_s0 + $0x28] sm:$0xff]  ;;  %v2841_v5 = vld [vmem:[#allocation3 + $0x4a4] ss:$16 sps:$4 sm:$0xff]  }
  0x58   :  { %v161_v63 = vcombine.low %v93_v50, %v99_v51  ;;  %v72_v41 = vld [vmem:[%s3428_s0 + $0x50] sm:$0xff]  ;;  %v106_v45 = vrot.slane %v67_v40, 4  ;;  %v2827_v50 = vld [vmem:[#allocation3 + $0x460] ss:$16 sps:$4 sm:$0xff]   ;;  %v101_v51 = vadd.f32 %v100_v44, %v66_v39  ;;  %v2844_v62 = vld [vmem:[#allocation3 + $0xac] ss:$16 sps:$4 sm:$0xff]  }
  0x59   :  { %1481 = vmatpush1.bf16.msra.mxu1 %v2789_v8  ;;  %v185_v1 = vcombine.low %v117_v54, %v123_v55  ;;  %v2811_v8 = vld [vmem:[#allocation3 + $0x404] ss:$16 sps:$4 sm:$0xff]   ;;  %v136_v46 = vrot.slane %v72_v41, 4  ;;  %v2857_v39 = vld [vmem:[#allocation3 + $0x500] ss:$16 sps:$4 sm:$0xff]  }
  0x5a   :  { %1522 = vmatpush1.bf16.msra.mxu0 %v2790_v13  ;;  %1482 = vmatprep.subr.bf16.mxu1 %v2791_v14  ;;  %v175_v4 = vrot.slane %v161_v63, %v3290_v57  ;;  %v107_v52 = vadd.f32 %v106_v45, %v67_v40  ;;  %v2835_v54 = vld [vmem:[#allocation3 + $0x484] ss:$16 sps:$4 sm:$0xff]   ;;  %v2874_v44 = vld [vmem:[#allocation3 + $0x14c] ss:$16 sps:$4 sm:$0xff]   ;;  %v2863_v45 = vld [vmem:[#allocation3 + $0x520] ss:$16 sps:$4 sm:$0xff]  }
  0x5b   :  { %1523 = vmatprep.subr.bf16.mxu0 %v2793_v23  ;;  %v193_v48 = vrot.slane %v185_v1, %v3290_v57 }
  0x5c   :  { %v176_v10 = vcombine.low %v168_v3, %v175_v4 }
  0x5d   :  { %1483 = vmatpush1.bf16.msra.mxu1 %v2795_v32  ;;  %v201_v11 = vcombine.low %v193_v48, %v200_v7  ;;  %v2826_v32 = vld [vmem:[#allocation3 + $0x4c] ss:$16 sps:$4 sm:$0xff]  }
  0x5e   :  { %1524 = vmatpush1.bf16.msra.mxu0 %v2796_v33  ;;  %1484 = vmatprep.subr.bf16.mxu1 %v2797_v38  ;;  %v2815_v33 = vld [vmem:[#allocation3 + $0x420] ss:$16 sps:$4 sm:$0xff]   ;;  %v2829_v38 = vld [vmem:[#allocation3 + $0x464] ss:$16 sps:$4 sm:$0xff]  }
  0x5f   :  { %1525 = vmatprep.subr.bf16.mxu0 %v2799_v43  ;;  %v214_v12 = vrot.slane %v201_v11, 7  ;;  %v73_v43 = vld [vmem:[%s3428_s0 + $0x58] sm:$0xff] }
  0x60   :  { %v142_v49 = vrot.slane %v73_v43, 4  ;;  %v2839_v11 = vld [vmem:[#allocation3 + $0x4a0] ss:$16 sps:$4 sm:$0xff]  }
  0x61   :  { %1485 = vmatpush1.bf16.msra.mxu1 %v2801_v53  ;;  %v216_v13 = vsel %vm215_vm0, %v214_v12, %v176_v10  ;;  %v137_v53 = vadd.f32 %v136_v46, %v72_v41  ;;  %v2865_v41 = vld [vmem:[#allocation3 + $0x524] ss:$16 sps:$4 sm:$0xff]  }
  0x62   :  { %1526 = vmatpush1.bf16.msra.mxu0 %v2802_v58  ;;  %1486 = vmatprep.subr.bf16.mxu1 %v2803_v60  ;;  %v218_v14 = vsel %vm217_vm1, %v214_v12, %v216_v13  ;;  %v143_v55 = vadd.f32 %v142_v49, %v73_v43  ;;  %v102_v58 = vrot.slane %v101_v51, 2  ;;  %v108_v60 = vrot.slane %v107_v52, 2  ;;  %v2866_v43 = vld [vmem:[#allocation3 + $0x128] ss:$16 sps:$4 sm:$0xff]   ;;  %v2871_v46 = vld [vmem:[#allocation3 + $0x544] ss:$16 sps:$4 sm:$0xff]  }
  0x63   :  { %1527 = vmatprep.subr.bf16.mxu0 %v2805_v0  ;;  %v220_v15 = vsel %vm219_vm2, %v214_v12, %v218_v14  ;;  %v138_v61 = vrot.slane %v137_v53, 2  ;;  %v2833_v0 = vld [vmem:[#allocation3 + $0x480] ss:$16 sps:$4 sm:$0xff]   ;;  %v2880_v49 = vld [vmem:[#allocation3 + $0x16c] ss:$16 sps:$4 sm:$0xff]  }
  0x64   :  { %v222_v16 = vsel %vm221_vm3, %v214_v12, %v220_v15  ;;  %v144_v63 = vrot.slane %v143_v55, 2  ;;  %v103_v1 = vadd.f32 %v102_v58, %v101_v51  ;;  %v109_v3 = vadd.f32 %v108_v60, %v107_v52  ;;  %v2847_v15 = vld [vmem:[#allocation3 + $0x4c4] ss:$16 sps:$4 sm:$0xff]   ;;  %v2878_v52 = vld [vmem:[#allocation3 + $0x168] ss:$16 sps:$4 sm:$0xff]  }
  0x65   :  { %1487 = vmatpush1.bf16.msra.mxu1 %v2807_v6  ;;  %v241_v17 = vmul.f32 0.125, %v222_v16  ;;  %v139_v4 = vadd.f32 %v138_v61, %v137_v53  ;;  %v2842_v6 = vld [vmem:[#allocation3 + $0xa8] ss:$16 sps:$4 sm:$0xff]   ;;  %v2877_v51 = vld [vmem:[#allocation3 + $0x564] ss:$16 sps:$4 sm:$0xff]  }
  0x66   :  { %1528 = vmatpush1.bf16.msra.mxu0 %v2808_v2  ;;  %1579 = vmatprep.subr.bf16.mxu1 %v2814_v9  ;;  %v145_v48 = vadd.f32 %v144_v63, %v143_v55  ;;  %v104_v2 = vrot.slane %v103_v1, 1  ;;  %v110_v7 = vrot.slane %v109_v3, 1  ;;  %v2850_v9 = vld [vmem:[#allocation3 + $0xcc] ss:$16 sps:$4 sm:$0xff]   ;;  %v2883_v58 = vld [vmem:[#allocation3 + $0x584] ss:$16 sps:$4 sm:$0xff]  }
  0x67   :  { %1538 = vmatprep.subr.bf16.mxu0 %v2811_v8  ;;  %v252_v18 = vrot.slane %v241_v17, %v3290_v57  ;;  %v245_v19 = vcombine.high %v241_v17, %v241_v17  ;;  %v140_v8 = vrot.slane %v139_v4, 1  ;;  %v2848_v17 = vld [vmem:[#allocation3 + $0xc8] ss:$16 sps:$4 sm:$0xff]  }
  0x68   :  { %v146_v10 = vrot.slane %v145_v48, 1  ;;  %v105_v12 = vadd.f32 %v104_v2, %v103_v1  ;;  %v111_v13 = vadd.f32 %v110_v7, %v109_v3  ;;  %v2884_v61 = vld [vmem:[#allocation3 + $0x188] ss:$16 sps:$4 sm:$0xff]   ;;  %v2889_v1 = vld [vmem:[#allocation3 + $0x5a4] ss:$16 sps:$4 sm:$0xff]  }
  0x69   :  { %v260_v20 = vcombine.high %v252_v18, %v252_v18  ;;  %v259_v21 = vrot.slane %v245_v19, %v3290_v57  ;;  %v3302_v22 = vpack.c.bf16 %v252_v18, %v252_v18  ;;  %v141_v14 = vadd.f32 %v140_v8, %v139_v4  ;;  %v2856_v19 = vld [vmem:[#allocation3 + $0xec] ss:$16 sps:$4 sm:$0xff]   ;;  %v2887_v4 = vld [vmem:[#allocation3 + $0x5a0] ss:$16 sps:$4 sm:$0xff]   ;;  %v2896_v2 = vld [vmem:[#allocation3 + $0x1c8] ss:$16 sps:$4 sm:$0xff]  }
  0x6a   :  { %v147_v16 = vadd.f32 %v146_v10, %v145_v48  ;;  %v177_v18 = vcombine.low %v105_v12, %v111_v13  ;;  %v2898_v48 = vld [vmem:[#allocation3 + $0x1cc] ss:$16 sps:$4 sm:$0xff]   ;;  %v2901_v8 = vld [vmem:[#allocation3 + $0x5e4] ss:$16 sps:$4 sm:$0xff]   ;;  %v2902_v10 = vld [vmem:[#allocation3 + $0x1e8] ss:$16 sps:$4 sm:$0xff]  }
  0x6b   :  { %v277_v23 = vpack.c.bf16 %v260_v20, %v260_v20  ;;  %v261_v24 = vcombine.high %v259_v21, %v259_v21  ;;  %v3304_v26 = vpack.c.bf16 %v259_v21, %v259_v21  ;;  %v2845_v21 = vld [vmem:[#allocation3 + $0x4c0] ss:$16 sps:$4 sm:$0xff]   ;;  %v2904_v7 = vld [vmem:[#allocation3 + $0x1ec] ss:$16 sps:$4 sm:$0xff]   ;;  %v2905_v12 = vld [vmem:[#allocation3 + $0x208] ss:$16 sps:$4 sm:$0xff]  }
  0x6c   :  { %v202_v20 = vcombine.low %v141_v14, %v147_v16  ;;  %v2910_v13 = vld [vmem:[#allocation3 + $0x22c] ss:$16 sps:$4 sm:$0xff]  }
  0x6d   :  { %1488 = vmatprep.mubr.bf16.mxu1 %v277_v23  ;;  %v3306_v28 = vpack.c.bf16 %v261_v24, %v261_v24  ;;  %v184_v24 = vrot.slane %v177_v18, %v3290_v57  ;;  %v2913_v16 = vld [vmem:[#allocation3 + $0x24c] ss:$16 sps:$4 sm:$0xff]  }
  0x6e   :  { %1489 = vmatmul.mubr.bf16.vlgmr.msra.gmra.mrb[0].mxu1 %v3302_v22  ;;  %v2916_v18 = vld [vmem:[#allocation3 + $0x26c] ss:$16 sps:$4 sm:$0xff]  }
  0x6f   :  { %1529 = vmatprep.mubr.bf16.mxu0 %v3306_v28  ;;  %1580 = vmatpush1.bf16.msra.mxu1 %v2812_v25  ;;  %v209_v25 = vrot.slane %v202_v20, %v3290_v57  ;;  %v2919_v20 = vld [vmem:[#allocation3 + $0x28c] ss:$16 sps:$4 sm:$0xff]  }
  0x70   :  { %1530 = vmatmul.mubr.bf16.vlgmr.msra.gmra.mrb[0].mxu0 %v3304_v26  ;;  %1581 = vmatprep.subr.bf16.mxu1 %v2820_v27  ;;  %v2854_v27 = vld [vmem:[#allocation3 + $0xe8] ss:$16 sps:$4 sm:$0xff]  }
  0x71   :  { %1539 = vmatpush1.bf16.msra.mxu0 %v2809_v29  ;;  %1611 = vmatprep.mubr.bf16.mxu1 %v277_v23  ;;  %v2853_v23 = vld [vmem:[#allocation3 + $0x4e4] ss:$16 sps:$4 sm:$0xff]   ;;  %v2862_v29 = vld [vmem:[#allocation3 + $0x10c] ss:$16 sps:$4 sm:$0xff]  }
  0x72   :  { %1540 = vmatprep.subr.bf16.mxu0 %v2817_v30  ;;  %v225_v30 = vrot.slane %v209_v25, 7  ;;  %v2928_v25 = vld [vmem:[#allocation3 + $0x2ec] ss:$16 sps:$4 sm:$0xff]  }
  0x73   :  { %1582 = vmatpush1.bf16.msra.mxu1 %v2818_v31  ;;  %v2851_v31 = vld [vmem:[#allocation3 + $0x4e0] ss:$16 sps:$4 sm:$0xff]  }
  0x74   :  { %1583 = vmatprep.subr.bf16.mxu1 %v2826_v32  ;;  %v2859_v32 = vld [vmem:[#allocation3 + $0x504] ss:$16 sps:$4 sm:$0xff]  }
  0x75   :  { %1541 = vmatpush1.bf16.msra.mxu0 %v2815_v33  ;;  %v2860_v33 = vld [vmem:[#allocation3 + $0x108] ss:$16 sps:$4 sm:$0xff]  }
  0x76   :  { %1542 = vmatprep.subr.bf16.mxu0 %v2823_v34  ;;  %v226_v34 = vsel %vm215_vm0, %v225_v30, %v184_v24  ;;  %v2925_v24 = vld [vmem:[#allocation3 + $0x2cc] ss:$16 sps:$4 sm:$0xff]  }
  0x77   :  { %1584 = vmatpush1.bf16.msra.mxu1 %v2824_v35  ;;  %v75_v35 = vld [vmem:[#allocation2 + $0x8] sm:$0xf] }
  0x78   :  { %1585 = vmatprep.subr.bf16.mxu1 %v2832_v36  ;;  %v227_v36 = vsel %vm217_vm1, %v225_v30, %v226_v34  ;;  %v3009_v34 = vld [vmem:[#allocation6 + $0x24] ss:$8 sps:$4 sm:$0xff]  }
  0x79   :  { %1543 = vmatpush1.bf16.msra.mxu0 %v2821_v37  ;;  %v2868_v37 = vld [vmem:[#allocation3 + $0x12c] ss:$16 sps:$4 sm:$0xff]  }
  0x7a   :  { %1544 = vmatprep.subr.bf16.mxu0 %v2829_v38  ;;  %v228_v38 = vsel %vm219_vm2, %v225_v30, %v227_v36  ;;  %v3007_v36 = vld [vmem:[#allocation6 + $0x20] ss:$8 sps:$4 sm:$0xff]  }
  0x7b   :  { %1586 = vmatpush1.bf16.msra.mxu1 %v2830_v42  ;;  %v229_v40 = vsel %vm221_vm3, %v225_v30, %v228_v38  ;;  %v3006_v30 = vld [vmem:[#allocation6 + $0x14] ss:$8 sps:$4 sm:$0xff]  }
  0x7c   :  { %1587 = vmatprep.subr.bf16.mxu1 %v2838_v47  ;;  %v233_v42 = vadd.f32 %v229_v40, %v75_v35  ;;  %v2872_v47 = vld [vmem:[#allocation3 + $0x148] ss:$16 sps:$4 sm:$0xff]   ;;  %v3012_v38 = vld [vmem:[#allocation6 + $0x34] ss:$8 sps:$4 sm:$0xff]  }
  0x7d   :  { %1545 = vmatpush1.bf16.msra.mxu0 %v2827_v50  ;;  %v2869_v50 = vld [vmem:[#allocation3 + $0x540] ss:$16 sps:$4 sm:$0xff]   ;;  %v2929_v35 = vld [vmem:[#allocation3 + $0x308] ss:$16 sps:$4 sm:$0xff]  }
  0x7e   :  { %1546 = vmatprep.subr.bf16.mxu0 %v2835_v54  ;;  %235 = vst [vmem:[#allocation2 + $0x8] sm:$0xf] %v233_v42  ;;  %v2886_v54 = vld [vmem:[#allocation3 + $0x18c] ss:$16 sps:$4 sm:$0xff]   ;;  %v3010_v40 = vld [vmem:[#allocation6 + $0x30] ss:$8 sps:$4 sm:$0xff]  }
  0x7f   :  { %1588 = vmatpush1.bf16.msra.mxu1 %v2836_v56  ;;  %v2875_v56 = vld [vmem:[#allocation3 + $0x560] ss:$16 sps:$4 sm:$0xff]   ;;  %v3015_v42 = vld [vmem:[#allocation6 + $0x44] ss:$8 sps:$4 sm:$0xff]  }
  0x80   :  { %1589 = vmatprep.subr.bf16.mxu1 %v2844_v62  ;;  %v2892_v62 = vld [vmem:[#allocation3 + $0x1ac] ss:$16 sps:$4 sm:$0xff]  }
  0x81   :  { %1547 = vmatpush1.bf16.msra.mxu0 %v2833_v0  ;;  %v2881_v0 = vld [vmem:[#allocation3 + $0x580] ss:$16 sps:$4 sm:$0xff]  }
  0x82   :  { %1548 = vmatprep.subr.bf16.mxu0 %v2841_v5  ;;  %v2890_v5 = vld [vmem:[#allocation3 + $0x1a8] ss:$16 sps:$4 sm:$0xff]  }
  0x83   :  { %1590 = vmatpush1.bf16.msra.mxu1 %v2842_v6  ;;  %v2895_v6 = vld [vmem:[#allocation3 + $0x5c4] ss:$16 sps:$4 sm:$0xff]  }
  0x84   :  { %1591 = vmatprep.subr.bf16.mxu1 %v2850_v9  ;;  %v2899_v9 = vld [vmem:[#allocation3 + $0x5e0] ss:$16 sps:$4 sm:$0xff]  }
  0x85   :  { %1549 = vmatpush1.bf16.msra.mxu0 %v2839_v11  ;;  %v240_v53 = vld [vmem:[#allocation2 + $0x8] sm:$0xf] }
  0x86   :  { %1550 = vmatprep.subr.bf16.mxu0 %v2847_v15  ;;  %v242_v55 = vmul.f32 0.125, %v240_v53  ;;  %v2907_v11 = vld [vmem:[#allocation3 + $0x20c] ss:$16 sps:$4 sm:$0xff]   ;;  %v2908_v15 = vld [vmem:[#allocation3 + $0x228] ss:$16 sps:$4 sm:$0xff]  }
  0x87   :  { %1592 = vmatpush1.bf16.msra.mxu1 %v2848_v17  ;;  %v2911_v17 = vld [vmem:[#allocation3 + $0x248] ss:$16 sps:$4 sm:$0xff]  }
  0x88   :  { %1593 = vmatprep.subr.bf16.mxu1 %v2856_v19  ;;  %v268_v60 = vrot.slane %v242_v55, %v3290_v57  ;;  %v2893_v57 = vld [vmem:[#allocation3 + $0x5c0] ss:$16 sps:$4 sm:$0xff]   ;;  %v2914_v19 = vld [vmem:[#allocation3 + $0x268] ss:$16 sps:$4 sm:$0xff]   ;;  %v3024_v55 = vld [vmem:[#allocation6 + $0x74] ss:$8 sps:$4 sm:$0xff]  }
  0x89   :  { %1551 = vmatpush1.bf16.msra.mxu0 %v2845_v21  ;;  %v2917_v21 = vld [vmem:[#allocation3 + $0x288] ss:$16 sps:$4 sm:$0xff]  }
  0x8a   :  { %1552 = vmatprep.subr.bf16.mxu0 %v2853_v23  ;;  %v269_v63 = vcombine.high %v268_v60, %v268_v60  ;;  %v3333_v14 = vpack.c.bf16 %v268_v60, %v268_v60  ;;  %v2922_v23 = vld [vmem:[#allocation3 + $0x2ac] ss:$16 sps:$4 sm:$0xff]   ;;  %v3019_v53 = vld [vmem:[#allocation6 + $0x60] ss:$8 sps:$4 sm:$0xff]  }
  0x8b   :  { %1594 = vmatpush1.bf16.msra.mxu1 %v2854_v27  ;;  %v3001_v27 = vld [vmem:[#allocation6] ss:$8 sps:$4 sm:$0xff]   ;;  %v2949_v60 = vld [vmem:[#allocation3 + $0x3cc] ss:$16 sps:$4 sm:$0xff]  }
  0x8c   :  { %1595 = vmatprep.subr.bf16.mxu1 %v2862_v29  ;;  %v3330_v3 = vpack.c.bf16 %v269_v63, %v269_v63  ;;  %v3003_v29 = vld [vmem:[#allocation6 + $0x4] ss:$8 sps:$4 sm:$0xff]   ;;  %v3025_v63 = vld [vmem:[#allocation6 + $0x80] ss:$8 sps:$4 sm:$0xff]  }
  0x8d   :  { %1553 = vmatpush1.bf16.msra.mxu0 %v2851_v31  ;;  %v2926_v31 = vld [vmem:[#allocation3 + $0x2e8] ss:$16 sps:$4 sm:$0xff]  }
  0x8e   :  { %1554 = vmatprep.subr.bf16.mxu0 %v2859_v32  ;;  %1570 = vmatprep.mubr.bf16.mxu0 %v3330_v3  ;;  %v3004_v32 = vld [vmem:[#allocation6 + $0x10] ss:$8 sps:$4 sm:$0xff]  }
  0x8f   :  { %1596 = vmatpush1.bf16.msra.mxu1 %v2860_v33  ;;  %v2931_v33 = vld [vmem:[#allocation3 + $0x30c] ss:$16 sps:$4 sm:$0xff]  }
  0x90   :  { %1597 = vmatprep.subr.bf16.mxu1 %v2868_v37  ;;  %v2934_v37 = vld [vmem:[#allocation3 + $0x32c] ss:$16 sps:$4 sm:$0xff]  }
  0x91   :  { %1555 = vmatpush1.bf16.msra.mxu0 %v2857_v39  ;;  %v2932_v39 = vld [vmem:[#allocation3 + $0x328] ss:$16 sps:$4 sm:$0xff]  }
  0x92   :  { %1556 = vmatprep.subr.bf16.mxu0 %v2865_v41  ;;  %v2937_v41 = vld [vmem:[#allocation3 + $0x34c] ss:$16 sps:$4 sm:$0xff]  }
  0x93   :  { %1598 = vmatpush1.bf16.msra.mxu1 %v2866_v43  ;;  %v2935_v43 = vld [vmem:[#allocation3 + $0x348] ss:$16 sps:$4 sm:$0xff]  }
  0x94   :  { %1599 = vmatprep.subr.bf16.mxu1 %v2874_v44  ;;  %v3013_v44 = vld [vmem:[#allocation6 + $0x40] ss:$8 sps:$4 sm:$0xff]  }
  0x95   :  { %1557 = vmatpush1.bf16.msra.mxu0 %v2863_v45  ;;  %v2940_v45 = vld [vmem:[#allocation3 + $0x36c] ss:$16 sps:$4 sm:$0xff]  }
  0x96   :  { %1558 = vmatprep.subr.bf16.mxu0 %v2871_v46  ;;  %v3018_v46 = vld [vmem:[#allocation6 + $0x54] ss:$8 sps:$4 sm:$0xff]  }
  0x97   :  { %1600 = vmatpush1.bf16.msra.mxu1 %v2872_v47  ;;  %v2938_v47 = vld [vmem:[#allocation3 + $0x368] ss:$16 sps:$4 sm:$0xff]  }
  0x98   :  { %1601 = vmatprep.subr.bf16.mxu1 %v2880_v49  ;;  %v3016_v49 = vld [vmem:[#allocation6 + $0x50] ss:$8 sps:$4 sm:$0xff]  }
  0x99   :  { %1559 = vmatpush1.bf16.msra.mxu0 %v2869_v50  ;;  %v2943_v50 = vld [vmem:[#allocation3 + $0x38c] ss:$16 sps:$4 sm:$0xff]  }
  0x9a   :  { %1560 = vmatprep.subr.bf16.mxu0 %v2877_v51  ;;  %v3021_v51 = vld [vmem:[#allocation6 + $0x64] ss:$8 sps:$4 sm:$0xff]  }
  0x9b   :  { %1602 = vmatpush1.bf16.msra.mxu1 %v2878_v52  ;;  %v2941_v52 = vld [vmem:[#allocation3 + $0x388] ss:$16 sps:$4 sm:$0xff]  }
  0x9c   :  { %1603 = vmatprep.subr.bf16.mxu1 %v2886_v54  ;;  %v2946_v54 = vld [vmem:[#allocation3 + $0x3ac] ss:$16 sps:$4 sm:$0xff]  }
  0x9d   :  { %1561 = vmatpush1.bf16.msra.mxu0 %v2875_v56  ;;  %v2944_v56 = vld [vmem:[#allocation3 + $0x3a8] ss:$16 sps:$4 sm:$0xff]  }
  0x9e   :  { %1562 = vmatprep.subr.bf16.mxu0 %v2883_v58  ;;  %v3022_v58 = vld [vmem:[#allocation6 + $0x70] ss:$8 sps:$4 sm:$0xff]  }
  0x9f   :  { %1604 = vmatpush1.bf16.msra.mxu1 %v2884_v61  ;;  %v3027_v61 = vld [vmem:[#allocation6 + $0x84] ss:$8 sps:$4 sm:$0xff]  }
  0xa0   :  { %1605 = vmatprep.subr.bf16.mxu1 %v2892_v62  ;;  %v2947_v62 = vld [vmem:[#allocation3 + $0x3c8] ss:$16 sps:$4 sm:$0xff]  }
  0xa1   :  { %1563 = vmatpush1.bf16.msra.mxu0 %v2881_v0  ;;  %v2952_v0 = vld [vmem:[#allocation3 + $0x3ec] ss:$16 sps:$4 sm:$0xff]  }
  0xa2   :  { %1564 = vmatprep.subr.bf16.mxu0 %v2889_v1  ;;  %v3030_v1 = vld [vmem:[#allocation6 + $0x94] ss:$8 sps:$4 sm:$0xff]  }
  0xa3   :  { %1606 = vmatpush1.bf16.msra.mxu1 %v2890_v5  ;;  %v3028_v5 = vld [vmem:[#allocation6 + $0x90] ss:$8 sps:$4 sm:$0xff]  }
  0xa4   :  { %1607 = vmatprep.subr.bf16.mxu1 %v2898_v48  ;;  %v3033_v48 = vld [vmem:[#allocation6 + $0xa4] ss:$8 sps:$4 sm:$0xff]  }
  0xa5   :  { %1565 = vmatpush1.bf16.msra.mxu0 %v2887_v4  ;;  %v2950_v4 = vld [vmem:[#allocation3 + $0x3e8] ss:$16 sps:$4 sm:$0xff]  }
  0xa6   :  { %1566 = vmatprep.subr.bf16.mxu0 %v2895_v6  ;;  %v2955_v6 = vld [vmem:[#allocation3 + $0x40c] ss:$16 sps:$4 sm:$0xff]  }
  0xa7   :  { %1608 = vmatpush1.bf16.msra.mxu1 %v2896_v2  ;;  %v2958_v2 = vld [vmem:[#allocation3 + $0x42c] ss:$16 sps:$4 sm:$0xff]  }
  0xa8   :  { %1609 = vmatprep.subr.bf16.mxu1 %v2904_v7  ;;  %v3031_v7 = vld [vmem:[#allocation6 + $0xa0] ss:$8 sps:$4 sm:$0xff]  }
  0xa9   :  { %1567 = vmatpush1.bf16.msra.mxu0 %v2893_v57  ;;  %v2953_v57 = vld [vmem:[#allocation3 + $0x408] ss:$16 sps:$4 sm:$0xff]  }
  0xaa   :  { %1568 = vmatprep.subr.bf16.mxu0 %v2901_v8  ;;  %v3036_v8 = vld [vmem:[#allocation6 + $0xb4] ss:$8 sps:$4 sm:$0xff]  }
  0xab   :  { %1610 = vmatpush1.bf16.msra.mxu1 %v2902_v10  ;;  %v2961_v10 = vld [vmem:[#allocation3 + $0x44c] ss:$16 sps:$4 sm:$0xff]  }
  0xac   :  { %1620 = vmatprep.subr.bf16.mxu1 %v2907_v11  ;;  %v3034_v11 = vld [vmem:[#allocation6 + $0xb0] ss:$8 sps:$4 sm:$0xff]  }
  0xad   :  { %1569 = vmatpush1.bf16.msra.mxu0 %v2899_v9  ;;  %v2956_v9 = vld [vmem:[#allocation3 + $0x428] ss:$16 sps:$4 sm:$0xff]  }
  0xae   :  { %1612 = vmatmul.mubr.bf16.vlgmr.msra.gmra.mrb[4].mxu1 %v3302_v22  ;;  %v2920_v22 = vld [vmem:[#allocation3 + $0x2a8] ss:$16 sps:$4 sm:$0xff]   ;;  %2106 = vmatprep.subr.bf16.mxu0 %v3003_v29 }
  0xaf   :  { %1621 = vmatpush1.bf16.msra.mxu1 %v2905_v12  ;;  %1652 = vmatprep.mubr.bf16.mxu1 %v3306_v28  ;;  %v2923_v28 = vld [vmem:[#allocation3 + $0x2c8] ss:$16 sps:$4 sm:$0xff]   ;;  %v3039_v12 = vld [vmem:[#allocation6 + $0xc4] ss:$8 sps:$4 sm:$0xff]  }
  0xb0   :  { %1571 = vmatmul.mubr.bf16.vlgmr.msra.gmra.mrb[0].mxu0 %v3333_v14  ;;  %1622 = vmatprep.subr.bf16.mxu1 %v2910_v13  ;;  %v2959_v13 = vld [vmem:[#allocation3 + $0x448] ss:$16 sps:$4 sm:$0xff]  }
  0xb1   :  { %2107 = vmatpush1.bf16.msra.mxu0 %v3001_v27  ;;  %v3048_v27 = vld [vmem:[#allocation6 + $0xf4] ss:$8 sps:$4 sm:$0xff]   ;;  %v2974_v29 = vld [vmem:[#allocation3 + $0x4e8] ss:$16 sps:$4 sm:$0xff]  }
  0xb2   :  { %2108 = vmatprep.subr.bf16.mxu0 %v3006_v30  ;;  %v3046_v30 = vld [vmem:[#allocation6 + $0xf0] ss:$8 sps:$4 sm:$0xff]  }
  0xb3   :  { %1623 = vmatpush1.bf16.msra.mxu1 %v2908_v15  ;;  %v2964_v15 = vld [vmem:[#allocation3 + $0x46c] ss:$16 sps:$4 sm:$0xff]  }
  0xb4   :  { %1624 = vmatprep.subr.bf16.mxu1 %v2913_v16  ;;  %v3037_v16 = vld [vmem:[#allocation6 + $0xc0] ss:$8 sps:$4 sm:$0xff]  }
  0xb5   :  { %2109 = vmatpush1.bf16.msra.mxu0 %v3004_v32  ;;  %v2977_v32 = vld [vmem:[#allocation3 + $0x508] ss:$16 sps:$4 sm:$0xff]  }
  0xb6   :  { %2110 = vmatprep.subr.bf16.mxu0 %v3009_v34  ;;  %v3051_v34 = vld [vmem:[#allocation6 + $0x104] ss:$8 sps:$4 sm:$0xff]  }
  0xb7   :  { %1625 = vmatpush1.bf16.msra.mxu1 %v2911_v17  ;;  %v3042_v17 = vld [vmem:[#allocation6 + $0xd4] ss:$8 sps:$4 sm:$0xff]  }
  0xb8   :  { %1626 = vmatprep.subr.bf16.mxu1 %v2916_v18  ;;  %v2967_v18 = vld [vmem:[#allocation3 + $0x48c] ss:$16 sps:$4 sm:$0xff]  }
  0xb9   :  { %2111 = vmatpush1.bf16.msra.mxu0 %v3007_v36  ;;  %v2985_v36 = vld [vmem:[#allocation3 + $0x54c] ss:$16 sps:$4 sm:$0xff]  }
  0xba   :  { %2112 = vmatprep.subr.bf16.mxu0 %v3012_v38  ;;  %v2988_v38 = vld [vmem:[#allocation3 + $0x56c] ss:$16 sps:$4 sm:$0xff]  }
  0xbb   :  { %1627 = vmatpush1.bf16.msra.mxu1 %v2914_v19  ;;  %v2965_v19 = vld [vmem:[#allocation3 + $0x488] ss:$16 sps:$4 sm:$0xff]  }
  0xbc   :  { %1628 = vmatprep.subr.bf16.mxu1 %v2919_v20  ;;  %v2970_v20 = vld [vmem:[#allocation3 + $0x4ac] ss:$16 sps:$4 sm:$0xff]  }
  0xbd   :  { %2113 = vmatpush1.bf16.msra.mxu0 %v3010_v40  ;;  %v2991_v40 = vld [vmem:[#allocation3 + $0x58c] ss:$16 sps:$4 sm:$0xff]  }
  0xbe   :  { %2114 = vmatprep.subr.bf16.mxu0 %v3015_v42  ;;  %v2994_v42 = vld [vmem:[#allocation3 + $0x5ac] ss:$16 sps:$4 sm:$0xff]  }
  0xbf   :  { %1629 = vmatpush1.bf16.msra.mxu1 %v2917_v21  ;;  %v2968_v21 = vld [vmem:[#allocation3 + $0x4a8] ss:$16 sps:$4 sm:$0xff]  }
  0xc0   :  { %1630 = vmatprep.subr.bf16.mxu1 %v2922_v23  ;;  %v2973_v23 = vld [vmem:[#allocation3 + $0x4cc] ss:$16 sps:$4 sm:$0xff]  }
  0xc1   :  { %2115 = vmatpush1.bf16.msra.mxu0 %v3013_v44  ;;  %v2997_v44 = vld [vmem:[#allocation3 + $0x5cc] ss:$16 sps:$4 sm:$0xff]  }
  0xc2   :  { %2116 = vmatprep.subr.bf16.mxu0 %v3018_v46  ;;  %v3000_v46 = vld [vmem:[#allocation3 + $0x5ec] ss:$16 sps:$4 sm:$0xff]  }
  0xc3   :  { %1631 = vmatpush1.bf16.msra.mxu1 %v2920_v22  ;;  %v3045_v22 = vld [vmem:[#allocation6 + $0xe4] ss:$8 sps:$4 sm:$0xff]  }
  0xc4   :  { %1632 = vmatprep.subr.bf16.mxu1 %v2925_v24  ;;  %v2971_v24 = vld [vmem:[#allocation3 + $0x4c8] ss:$16 sps:$4 sm:$0xff]  }
  0xc5   :  { %2117 = vmatpush1.bf16.msra.mxu0 %v3016_v49 }
  0xc6   :  { %2118 = vmatprep.subr.bf16.mxu0 %v3021_v51 }
  0xc7   :  { %1633 = vmatpush1.bf16.msra.mxu1 %v2923_v28  ;;  %v3043_v28 = vld [vmem:[#allocation6 + $0xe0] ss:$8 sps:$4 sm:$0xff]  }
  0xc8   :  { %1634 = vmatprep.subr.bf16.mxu1 %v2928_v25  ;;  %v2976_v25 = vld [vmem:[#allocation3 + $0x4ec] ss:$16 sps:$4 sm:$0xff]  }
  0xc9   :  { %2119 = vmatpush1.bf16.msra.mxu0 %v3019_v53  ;;  %v478_v53 = vsub.s32 0, %v3272_v59 }
  0xca   :  { %2120 = vmatprep.subr.bf16.mxu0 %v3024_v55  ;;  %v482_v55 = vsub.s32 1, %v3272_v59 }
  0xcb   :  { %1635 = vmatpush1.bf16.msra.mxu1 %v2926_v31  ;;  %v2979_v31 = vld [vmem:[#allocation3 + $0x50c] ss:$16 sps:$4 sm:$0xff]  }
  0xcc   :  { %1636 = vmatprep.subr.bf16.mxu1 %v2931_v33  ;;  %v2982_v33 = vld [vmem:[#allocation3 + $0x52c] ss:$16 sps:$4 sm:$0xff]  }
  0xcd   :  { %2121 = vmatpush1.bf16.msra.mxu0 %v3022_v58 }
  0xce   :  { %2122 = vmatprep.subr.bf16.mxu0 %v3027_v61 }
  0xcf   :  { %1637 = vmatpush1.bf16.msra.mxu1 %v2929_v35  ;;  %v2980_v35 = vld [vmem:[#allocation3 + $0x528] ss:$16 sps:$4 sm:$0xff]  }
  0xd0   :  { %1638 = vmatprep.subr.bf16.mxu1 %v2934_v37  ;;  %v2983_v37 = vld [vmem:[#allocation3 + $0x548] ss:$16 sps:$4 sm:$0xff]  }
  0xd1   :  { %2123 = vmatpush1.bf16.msra.mxu0 %v3025_v63 }
  0xd2   :  { %2124 = vmatprep.subr.bf16.mxu0 %v3030_v1 }
  0xd3   :  { %1639 = vmatpush1.bf16.msra.mxu1 %v2932_v39  ;;  %v2986_v39 = vld [vmem:[#allocation3 + $0x568] ss:$16 sps:$4 sm:$0xff]  }
  0xd4   :  { %1640 = vmatprep.subr.bf16.mxu1 %v2937_v41  ;;  %v2989_v41 = vld [vmem:[#allocation3 + $0x588] ss:$16 sps:$4 sm:$0xff]  }
  0xd5   :  { %2125 = vmatpush1.bf16.msra.mxu0 %v3028_v5 }
  0xd6   :  { %2126 = vmatprep.subr.bf16.mxu0 %v3033_v48 }
  0xd7   :  { %1641 = vmatpush1.bf16.msra.mxu1 %v2935_v43  ;;  %v2992_v43 = vld [vmem:[#allocation3 + $0x5a8] ss:$16 sps:$4 sm:$0xff]  }
  0xd8   :  { %1642 = vmatprep.subr.bf16.mxu1 %v2940_v45  ;;  %v2995_v45 = vld [vmem:[#allocation3 + $0x5c8] ss:$16 sps:$4 sm:$0xff]  }
  0xd9   :  { %2127 = vmatpush1.bf16.msra.mxu0 %v3031_v7 }
  0xda   :  { %2128 = vmatprep.subr.bf16.mxu0 %v3036_v8  ;;  %v3097_v8 = vld [vmem:[%s3433_s5 + $0x40] sm:$0xff]  }
  0xdb   :  { %1643 = vmatpush1.bf16.msra.mxu1 %v2938_v47  ;;  %v2998_v47 = vld [vmem:[#allocation3 + $0x5e8] ss:$16 sps:$4 sm:$0xff]  }
  0xdc   :  { %1644 = vmatprep.subr.bf16.mxu1 %v2943_v50 }
  0xdd   :  { %2129 = vmatpush1.bf16.msra.mxu0 %v3034_v11  ;;  %v3052_v11 = vld [vmem:[#allocation6 + $0x110] ss:$8 sps:$4 sm:$0xff]  }
  0xde   :  { %2130 = vmatprep.subr.bf16.mxu0 %v3039_v12  ;;  %v3100_v12 = vld [vmem:[%s3433_s5 + $0x8] sm:$0xff]  }
  0xdf   :  { %1645 = vmatpush1.bf16.msra.mxu1 %v2941_v52 }
  0xe0   :  { %1646 = vmatprep.subr.bf16.mxu1 %v2946_v54  ;;  %v3345_v54 = vld [vmem:[%s3430_s2] sm:$0xf] }
  0xe1   :  { %2131 = vmatpush1.bf16.msra.mxu0 %v3037_v16  ;;  %v3055_v16 = vld [vmem:[#allocation6 + $0x120] ss:$8 sps:$4 sm:$0xff]  }
  0xe2   :  { %2132 = vmatprep.subr.bf16.mxu0 %v3042_v17  ;;  %v3102_v17 = vld [vmem:[%s3433_s5 + $0x10] sm:$0xff]  }
  0xe3   :  { %1647 = vmatpush1.bf16.msra.mxu1 %v2944_v56  ;;  %v479_v56 = vrot.slane %v3345_v54, %v478_v53 }
  0xe4   :  { %1648 = vmatprep.subr.bf16.mxu1 %v2949_v60 }
  0xe7   :  { %1649 = vmatpush1.bf16.msra.mxu1 %v2947_v62 }
  0xe8   :  { %1650 = vmatprep.subr.bf16.mxu1 %v2952_v0 }
  0xeb   :  { %1651 = vmatpush1.bf16.msra.mxu1 %v2950_v4 }
  0xec   :  { %1661 = vmatprep.subr.bf16.mxu1 %v2955_v6 }
  0xee   :  { %1653 = vmatmul.mubr.bf16.vlgmr.msra.gmra.mrb[4].mxu1 %v3304_v26  ;;  %v2962_v26 = vld [vmem:[#allocation3 + $0x468] ss:$16 sps:$4 sm:$0xff]  }
  0xef   :  { %1662 = vmatpush1.bf16.msra.mxu1 %v2953_v57  ;;  %1693 = vmatprep.mubr.bf16.mxu1 %v3330_v3  ;;  %v3040_v3 = vld [vmem:[#allocation6 + $0xd0] ss:$8 sps:$4 sm:$0xff]   ;;  %v3049_v57 = vld [vmem:[#allocation6 + $0x100] ss:$8 sps:$4 sm:$0xff]  }
  0xf0   :  { %1663 = vmatprep.subr.bf16.mxu1 %v2958_v2  ;;  %2133 = vmatpush1.bf16.msra.mxu0 %v3040_v3  ;;  %v3054_v2 = vld [vmem:[#allocation6 + $0x114] ss:$8 sps:$4 sm:$0xff]   ;;  %v3058_v3 = vld [vmem:[#allocation6 + $0x130] ss:$8 sps:$4 sm:$0xff]  }
  0xf1   :  { %2134 = vmatprep.subr.bf16.mxu0 %v3045_v22  ;;  %v3106_v22 = vld [vmem:[%s3433_s5 + $0x20] sm:$0xff]  }
  0xf3   :  { %1664 = vmatpush1.bf16.msra.mxu1 %v2956_v9  ;;  %v3098_v9 = vld [vmem:[%s3433_s5] sm:$0xff]  }
  0xf4   :  { %1665 = vmatprep.subr.bf16.mxu1 %v2961_v10  ;;  %2135 = vmatpush1.bf16.msra.mxu0 %v3043_v28  ;;  %v3099_v10 = vld [vmem:[%s3433_s5 + $0x48] sm:$0xff]  }
  0xf5   :  { %2136 = vmatprep.subr.bf16.mxu0 %v3048_v27  ;;  %v3107_v28 = vld [vmem:[%s3433_s5 + $0x68] sm:$0xff]  }
  0xf6   :  { %v3108_v27 = vld [vmem:[%s3433_s5 + $0x28] sm:$0xff]  }
  0xf7   :  { %1666 = vmatpush1.bf16.msra.mxu1 %v2959_v13  ;;  %v3057_v13 = vld [vmem:[#allocation6 + $0x124] ss:$8 sps:$4 sm:$0xff]  }
  0xf8   :  { %1667 = vmatprep.subr.bf16.mxu1 %v2964_v15  ;;  %2137 = vmatpush1.bf16.msra.mxu0 %v3046_v30  ;;  %v3101_v15 = vld [vmem:[%s3433_s5 + $0x50] sm:$0xff]  }
  0xf9   :  { %2147 = vmatprep.subr.bf16.mxu0 %v3051_v34  ;;  %v3067_v30 = vld [vmem:[#allocation6 + $0x160] ss:$8 sps:$4 sm:$0xff]  }
  0xfa   :  { %v3073_v34 = vld [vmem:[#allocation6 + $0x180] ss:$8 sps:$4 sm:$0xff]  }
  0xfb   :  { %1668 = vmatpush1.bf16.msra.mxu1 %v2962_v26  ;;  %v3060_v26 = vld [vmem:[#allocation6 + $0x134] ss:$8 sps:$4 sm:$0xff]  }
  0xfc   :  { %1669 = vmatprep.subr.bf16.mxu1 %v2967_v18  ;;  %v3103_v18 = vld [vmem:[%s3433_s5 + $0x58] sm:$0xff]  }
  0xff   :  { %1670 = vmatpush1.bf16.msra.mxu1 %v2965_v19  ;;  %v3104_v19 = vld [vmem:[%s3433_s5 + $0x18] sm:$0xff]  }
 0x100   :  { %1671 = vmatprep.subr.bf16.mxu1 %v2970_v20  ;;  %v3063_v20 = vld [vmem:[#allocation6 + $0x144] ss:$8 sps:$4 sm:$0xff]  }
 0x103   :  { %1672 = vmatpush1.bf16.msra.mxu1 %v2968_v21  ;;  %v3105_v21 = vld [vmem:[%s3433_s5 + $0x60] sm:$0xff]  }
 0x104   :  { %1673 = vmatprep.subr.bf16.mxu1 %v2973_v23  ;;  %v3061_v23 = vld [vmem:[#allocation6 + $0x140] ss:$8 sps:$4 sm:$0xff]  }
 0x107   :  { %1674 = vmatpush1.bf16.msra.mxu1 %v2971_v24  ;;  %v3066_v24 = vld [vmem:[#allocation6 + $0x154] ss:$8 sps:$4 sm:$0xff]  }
 0x108   :  { %1675 = vmatprep.subr.bf16.mxu1 %v2976_v25  ;;  %v3064_v25 = vld [vmem:[#allocation6 + $0x150] ss:$8 sps:$4 sm:$0xff]  }
 0x10b   :  { %1676 = vmatpush1.bf16.msra.mxu1 %v2974_v29  ;;  %v3069_v29 = vld [vmem:[#allocation6 + $0x164] ss:$8 sps:$4 sm:$0xff]  }
 0x10c   :  { %1677 = vmatprep.subr.bf16.mxu1 %v2979_v31  ;;  %v3072_v31 = vld [vmem:[#allocation6 + $0x174] ss:$8 sps:$4 sm:$0xff]  }
 0x10f   :  { %1678 = vmatpush1.bf16.msra.mxu1 %v2977_v32  ;;  %v3070_v32 = vld [vmem:[#allocation6 + $0x170] ss:$8 sps:$4 sm:$0xff]  }
 0x110   :  { %1679 = vmatprep.subr.bf16.mxu1 %v2982_v33  ;;  %v3075_v33 = vld [vmem:[#allocation6 + $0x184] ss:$8 sps:$4 sm:$0xff]  }
 0x113   :  { %1680 = vmatpush1.bf16.msra.mxu1 %v2980_v35  ;;  %v3078_v35 = vld [vmem:[#allocation6 + $0x194] ss:$8 sps:$4 sm:$0xff]  }
 0x114   :  { %1681 = vmatprep.subr.bf16.mxu1 %v2985_v36  ;;  %v3076_v36 = vld [vmem:[#allocation6 + $0x190] ss:$8 sps:$4 sm:$0xff]  }
 0x117   :  { %1682 = vmatpush1.bf16.msra.mxu1 %v2983_v37  ;;  %v3081_v37 = vld [vmem:[#allocation6 + $0x1a4] ss:$8 sps:$4 sm:$0xff]  }
 0x118   :  { %1683 = vmatprep.subr.bf16.mxu1 %v2988_v38  ;;  %v3079_v38 = vld [vmem:[#allocation6 + $0x1a0] ss:$8 sps:$4 sm:$0xff]  }
 0x11b   :  { %1684 = vmatpush1.bf16.msra.mxu1 %v2986_v39  ;;  %v3084_v39 = vld [vmem:[#allocation6 + $0x1b4] ss:$8 sps:$4 sm:$0xff]  }
 0x11c   :  { %1685 = vmatprep.subr.bf16.mxu1 %v2991_v40  ;;  %v3082_v40 = vld [vmem:[#allocation6 + $0x1b0] ss:$8 sps:$4 sm:$0xff]  }
 0x11f   :  { %1686 = vmatpush1.bf16.msra.mxu1 %v2989_v41  ;;  %v3087_v41 = vld [vmem:[#allocation6 + $0x1c4] ss:$8 sps:$4 sm:$0xff]  }
 0x120   :  { %1687 = vmatprep.subr.bf16.mxu1 %v2994_v42  ;;  %v3085_v42 = vld [vmem:[#allocation6 + $0x1c0] ss:$8 sps:$4 sm:$0xff]  }
 0x123   :  { %1688 = vmatpush1.bf16.msra.mxu1 %v2992_v43  ;;  %v3090_v43 = vld [vmem:[#allocation6 + $0x1d4] ss:$8 sps:$4 sm:$0xff]  }
 0x124   :  { %1689 = vmatprep.subr.bf16.mxu1 %v2997_v44  ;;  %v3088_v44 = vld [vmem:[#allocation6 + $0x1d0] ss:$8 sps:$4 sm:$0xff]  }
 0x127   :  { %1690 = vmatpush1.bf16.msra.mxu1 %v2995_v45  ;;  %v3093_v45 = vld [vmem:[#allocation6 + $0x1e4] ss:$8 sps:$4 sm:$0xff]  }
 0x128   :  { %1691 = vmatprep.subr.bf16.mxu1 %v3000_v46  ;;  %v3091_v46 = vld [vmem:[#allocation6 + $0x1e0] ss:$8 sps:$4 sm:$0xff]  }
 0x12b   :  { %1692 = vmatpush1.bf16.msra.mxu1 %v2998_v47  ;;  %v3096_v47 = vld [vmem:[#allocation6 + $0x1f4] ss:$8 sps:$4 sm:$0xff]  }
 0x12c   :  { %2658 = vmatprep.subr.bf16.mxu1 %v3097_v8 }
 0x12e   :  { %1694 = vmatmul.mubr.bf16.vlgmr.msra.gmra.mrb[4].mxu1 %v3333_v14  ;;  %v483_v14 = vrot.slane %v3345_v54, %v482_v55 }
 0x12f   :  { %2659 = vmatpush3.bf16.msra.mxu1 %v3098_v9 }
 0x130   :  { %2660 = vmatprep.subr.bf16.mxu1 %v3099_v10 }
 0x133   :  { %2661 = vmatpush3.bf16.msra.mxu1 %v3100_v12 }
 0x134   :  { %2662 = vmatprep.subr.bf16.mxu1 %v3101_v15 }
 0x137   :  { %2663 = vmatpush3.bf16.msra.mxu1 %v3102_v17 }
 0x138   :  { %2664 = vmatprep.subr.bf16.mxu1 %v3103_v18 }
 0x13b   :  { %2665 = vmatpush3.bf16.msra.mxu1 %v3104_v19 }
 0x13c   :  { %2666 = vmatprep.subr.bf16.mxu1 %v3105_v21 }
 0x13f   :  { %2667 = vmatpush3.bf16.msra.mxu1 %v3106_v22 }
 0x140   :  { %2668 = vmatprep.subr.bf16.mxu1 %v3107_v28 }
 0x141   :  { %v1490_v49 = vpop.f32.mrb[0].mxu1 }
 0x142   :  { %v1492_v50 = vpop.f32.mrb[1].mxu1  ;;  %v1491_v58 = vadd.f32 %v1490_v49, %v479_v56  ;;  %v3094_v49 = vld [vmem:[#allocation6 + $0x1f0] ss:$8 sps:$4 sm:$0xff]  }
 0x143   :  { %v1494_v51 = vpop.f32.mrb[2].mxu1  ;;  %v1493_v60 = vadd.f32 %v1492_v50, %v483_v14  ;;  %2669 = vmatpush3.bf16.msra.mxu1 %v3108_v27  ;;  %v486_v50 = vsub.s32 2, %v3272_v59 }
 0x144   :  { %v1495_v52 = vpop.f32.mrb[3].mxu1  ;;  %v490_v51 = vsub.s32 3, %v3272_v59 }
 0x145   :  { %v487_v52 = vrot.slane %v3345_v54, %v486_v50 }
 0x146   :  { %v491_v56 = vrot.slane %v3345_v54, %v490_v51  ;;  %v3110_v54 = vld [vmem:[%s3433_s5 + $0x30] sm:$0xff]  }
 0x183   :  { %v1572_v61 = vpop.f32.mrb[0].mxu0 }
 0x184   :  { %v2681_v62 = vadd.f32 %v1572_v61, %v1491_v58  ;;  %v1574_v63 = vpop.f32.mrb[1].mxu0 }
 0x185   :  { %v2683_v0 = vadd.f32 %v1574_v63, %v1493_v60  ;;  %v1576_v1 = vpop.f32.mrb[2].mxu0 }
 0x186   :  { %v1702_v4 = vmax.f32 %v2681_v62, 0.0  ;;  %v1577_v5 = vpop.f32.mrb[3].mxu0 }
 0x187   :  { %v1703_v6 = vmax.f32 %v2683_v0, 0.0 }
 0x188   :  { %v1706_v7 = vpack.c.bf16 %v1702_v4, %v1702_v4 }
 0x189   :  { %v1707_v48 = vpack.c.bf16 %v1703_v6, %v1703_v6  ;;  %v3109_v6 = vld [vmem:[%s3433_s5 + $0x70] sm:$0xff]  }
 0x18a   :  { %2670 = vmatprep.subr.bf16.mxu1 %v3109_v6 }
 0x18b   :  { %2138 = vmatprep.mubr.bf16.mxu0 %v1707_v48  ;;  %2671 = vmatpush3.bf16.msra.mxu1 %v3110_v54  ;;  %v3111_v48 = vld [vmem:[%s3433_s5 + $0x78] sm:$0xff]  }
 0x18c   :  { %2139 = vmatmul.mubr.bf16.vlgmr.msra.gmra.mrb[4].mxu0 %v1706_v7  ;;  %2672 = vmatprep.subr.bf16.mxu1 %v3111_v48 }
 0x18d   :  { %2148 = vmatpush1.bf16.msra.mxu0 %v3049_v57  ;;  %v3112_v57 = vld [vmem:[%s3433_s5 + $0x38] sm:$0xff]  }
 0x18e   :  { %2149 = vmatprep.subr.bf16.mxu0 %v3054_v2  ;;  %v1774_v2 = vld [vmem:[%s3432_s4] sm:$0x3] }
 0x18f   :  { %2673 = vmatpush3.bf16.msra.mxu1 %v3112_v57  ;;  %v1779_v7 = vrot.slane %v1774_v2, %v478_v53  ;;  %v1783_v8 = vrot.slane %v1774_v2, %v482_v55  ;;  %v2641_v53 = vld [vmem:[%s3434_s6] ss:$0 sm:$0xff] }
 0x191   :  { %2150 = vmatpush1.bf16.msra.mxu0 %v3052_v11 }
 0x192   :  { %2151 = vmatprep.subr.bf16.mxu0 %v3057_v13 }
 0x195   :  { %2152 = vmatpush1.bf16.msra.mxu0 %v3055_v16 }
 0x196   :  { %2153 = vmatprep.subr.bf16.mxu0 %v3060_v26 }
 0x199   :  { %2154 = vmatpush1.bf16.msra.mxu0 %v3058_v3 }
 0x19a   :  { %2155 = vmatprep.subr.bf16.mxu0 %v3063_v20 }
 0x19d   :  { %2156 = vmatpush1.bf16.msra.mxu0 %v3061_v23 }
 0x19e   :  { %2157 = vmatprep.subr.bf16.mxu0 %v3066_v24 }
 0x1a1   :  { %2158 = vmatpush1.bf16.msra.mxu0 %v3064_v25 }
 0x1a2   :  { %2159 = vmatprep.subr.bf16.mxu0 %v3069_v29 }
 0x1a5   :  { %2160 = vmatpush1.bf16.msra.mxu0 %v3067_v30 }
 0x1a6   :  { %2161 = vmatprep.subr.bf16.mxu0 %v3072_v31 }
 0x1a9   :  { %2162 = vmatpush1.bf16.msra.mxu0 %v3070_v32 }
 0x1aa   :  { %2163 = vmatprep.subr.bf16.mxu0 %v3075_v33 }
 0x1ad   :  { %2164 = vmatpush1.bf16.msra.mxu0 %v3073_v34 }
 0x1ae   :  { %2165 = vmatprep.subr.bf16.mxu0 %v3078_v35 }
 0x1b1   :  { %2166 = vmatpush1.bf16.msra.mxu0 %v3076_v36 }
 0x1b2   :  { %2167 = vmatprep.subr.bf16.mxu0 %v3081_v37 }
 0x1b5   :  { %2168 = vmatpush1.bf16.msra.mxu0 %v3079_v38 }
 0x1b6   :  { %2169 = vmatprep.subr.bf16.mxu0 %v3084_v39 }
 0x1b9   :  { %2170 = vmatpush1.bf16.msra.mxu0 %v3082_v40 }
 0x1ba   :  { %2171 = vmatprep.subr.bf16.mxu0 %v3087_v41 }
 0x1bd   :  { %2172 = vmatpush1.bf16.msra.mxu0 %v3085_v42 }
 0x1be   :  { %2173 = vmatprep.subr.bf16.mxu0 %v3090_v43 }
 0x1c1   :  { %2174 = vmatpush1.bf16.msra.mxu0 %v3088_v44 }
 0x1c2   :  { %2175 = vmatprep.subr.bf16.mxu0 %v3093_v45 }
 0x1c5   :  { %2176 = vmatpush1.bf16.msra.mxu0 %v3091_v46 }
 0x1c6   :  { %2177 = vmatprep.subr.bf16.mxu0 %v3096_v47 }
 0x1c9   :  { %2178 = vmatpush1.bf16.msra.mxu0 %v3094_v49 }
 0x201   :  { %v1695_v14 = vpop.f32.mrb[4].mxu1 }
 0x202   :  { %v2684_v58 = vadd.f32 %v1695_v14, %v487_v52  ;;  %v1697_v60 = vpop.f32.mrb[5].mxu1 }
 0x203   :  { %v2685_v61 = vadd.f32 %v1697_v60, %v491_v56  ;;  %v1699_v62 = vpop.f32.mrb[6].mxu1 }
 0x204   :  { %v1704_v63 = vmax.f32 %v2684_v58, 0.0  ;;  %v1700_v0 = vpop.f32.mrb[7].mxu1 }
 0x205   :  { %v1705_v1 = vmax.f32 %v2685_v61, 0.0 }
 0x206   :  { %v1708_v5 = vpack.c.bf16 %v1704_v63, %v1704_v63 }
 0x207   :  { %v1709_v4 = vpack.c.bf16 %v1705_v1, %v1705_v1 }
 0x209   :  { %2179 = vmatprep.mubr.bf16.mxu0 %v1709_v4 }
 0x20a   :  { %2180 = vmatmul.mubr.bf16.vlgmr.msra.gmra.mrb[4].mxu0 %v1708_v5 }
 0x2dd   :  { %v2181_v9 = vpop.f32.mrb[4].mxu0 }
 0x2de   :  { %v2686_v10 = vadd.f32 %v2181_v9, %v1779_v7  ;;  %v2183_v11 = vpop.f32.mrb[5].mxu0 }
 0x2df   :  { %v2687_v12 = vadd.f32 %v2183_v11, %v1783_v8  ;;  %v2185_v13 = vpop.f32.mrb[6].mxu0 }
 0x2e0   :  { %v2188_v15 = vmax.f32 %v2686_v10, 0.0  ;;  %v2186_v16 = vpop.f32.mrb[7].mxu0 }
 0x2e1   :  { %v2189_v17 = vmax.f32 %v2687_v12, 0.0 }
 0x2e2   :  { %v2190_v18 = vpack.c.bf16 %v2188_v15, %v2188_v15 }
 0x2e3   :  { %v2191_v26 = vpack.c.bf16 %v2189_v17, %v2189_v17 }
 0x2e5   :  { %2359 = vmatprep.mubr.bf16.mxu1 %v2191_v26 }
 0x2e6   :  { %2360 = vmatmul.mubr.bf16.vlgmr.msra.gmra.mrb[8].mxu1 %v2190_v18 }
 0x3b9   :  { %v2674_v3 = vpop.f32.mrb[8].mxu1 }
 0x3ba   :  { %v2675_v19 = vpop.f32.mrb[9].mxu1 }
 0x3bb   :  { %v2676_v59 = vadd.f32 %v2675_v19, %v2674_v3  ;;  %v2677_v55 = vpop.f32.mrb[10].mxu1 }
 0x3bc   :  { %v2678_v20 = vpop.f32.mrb[11].mxu1 }
 0x3bd   :  { %v2362_v21 = vadd.f32 %v2676_v59, %v2641_v53 }
 0x3bf   :  { %2368 = vst.msk [vmem:[#allocation8] sm:$0x3] %vm2367_vm4, %v2362_v21 }
 0x3c0   :  { %3168 = shalt.err (!%p3165_p6)
}
 0x3c1   :  { %s3169_s6 = scalar_lea.hbm %s3435_s7, 32 }
 0x3c2   :  { %p3170_p7 = scmp.ne.s32.totalorder %s3435_s7, %s3169_s6  ;;  %p3173_p8 = scmp.lt.u32.totalorder %s3169_s6, %s3435_s7 }
 0x3c4   :  { %p3175_p9 = pnand %p3173_p8, %p3170_p7 }
 0x3c6   :  { %3178 = shalt.err (!%p3175_p9)
}
 0x3c7   :  { %2378 = dma.vmem_to_hbm [thread:$0]  %s2376_s11, 32, %s3435_s7, [#allocation5]  }
 0x3c8   :  { %3183 = dma.done.wait [#allocation5], 32  }
 0x3c9   :  { %3184 = vsyncadd [#allocation5], 4294967264 }
 0x3ca   :  { %2382 = vsyncpa [#allocation4], 1 }
 0x3cb   :  { %2383 = vsyncpa [#allocation7], 1 }
 0x3cc   :  { %2384 = vsyncpa [#allocation5], 1 }

</bundles_post_ra>
